<compile_context>
chip_gen: v7x
topology: tpu7x:2x2x1
jax: 0.10.0
libtpu: 0.0.40
codegen_flags: <defaults>
</compile_context>

<pallas_src>
import numpy as np
import jax
import jax.numpy as jnp
from jax.experimental import pallas as pl
from jax.experimental.pallas import tpu as pltpu

# ----------------------------------------------------------------------------
# Hyperparameters (small, consistent with the module's __init__)
# ----------------------------------------------------------------------------
LEN_MAX_SEQ = 16                 # hp.max_seq_len
D_MODEL     = 32                 # hp.decoder_hidden (d_word_vec == d_model)
N_LAYERS    = 2                  # hp.decoder_layer
D_STATE     = 128
D_CONV      = 3
HEADDIM     = D_MODEL // 2       # 16
EXPAND      = 2
D_INNER     = EXPAND * D_MODEL   # 64
NHEADS      = D_INNER // HEADDIM # 4
NGROUPS     = 1
CONV_DIM    = D_INNER + 2 * NGROUPS * D_STATE              # 320
D_IN_PROJ   = 2 * D_INNER + 2 * NGROUPS * D_STATE + NHEADS # 388
EPS         = 1e-5


def _silu(x):
    return x / (1.0 + jnp.exp(-x))


# ----------------------------------------------------------------------------
# Fused decoder kernel: posenc add + N_LAYERS Mamba2 blocks, one batch chunk
# per grid step.
# ----------------------------------------------------------------------------
def _decoder_kernel(x_ref, pos_ref,
                    w_z_ref, w_x_ref, w_bc_ref, w_dt_ref,
                    conv_x_ref, conv_bc_ref,
                    head_ref, d_ref, norm_ref, w_out_ref,
                    o_ref):
    BB, L, D = x_ref.shape
    BL = BB * L
    P = HEADDIM

    # ---- fused positional-encoding add, then flatten (batch, seq) rows
    x = x_ref[...] + pos_ref[...]                     # (BB, L, D) + (L, D)
    xf = x.reshape(BL, D)                             # (BL, D)

    # ---- causal masks / cumulative-sum operator (shared across layers/heads)
    r = jax.lax.broadcasted_iota(jnp.int32, (L, L), 0)
    c = jax.lax.broadcasted_iota(jnp.int32, (L, L), 1)
    tril_b = r >= c
    tril_f = tril_b.astype(jnp.float32)

    if BB > 1:  # mask rows that would read across a batch boundary when shifting
        row_in_seq = jax.lax.broadcasted_iota(jnp.int32, (BL, 1), 0) % L
    else:
        row_in_seq = None

    def causal_conv_silu(u, wb):
        # u:  (BL, C) f32 activations
        # wb: (D_CONV + 1, C) f32, rows 0..D_CONV-1 = taps, row D_CONV = bias
        C = u.shape[1]
        acc = u * wb[D_CONV - 1:D_CONV, :]            # tap for x[t]
        for s in range(1, D_CONV):                    # tap for x[t - s]
            shifted = jnp.concatenate(
                [jnp.zeros((s, C), jnp.float32), u[:BL - s, :]], axis=0)
            if row_in_seq is not None:
                shifted = jnp.where(row_in_seq >= s, shifted, 0.0)
            acc = acc + shifted * wb[D_CONV - 1 - s:D_CONV - s, :]
        return _silu(acc + wb[D_CONV:D_CONV + 1, :])

    for l in range(N_LAYERS):
        xf_bf = xf.astype(jnp.bfloat16)

        # ---- in_proj, lane-aligned splits (z | x | BC | dt), f32 accumulation
        z     = jnp.dot(xf_bf, w_z_ref[l],  preferred_element_type=jnp.float32)  # (BL, 64)
        xpre  = jnp.dot(xf_bf, w_x_ref[l],  preferred_element_type=jnp.float32)  # (BL, 64)
        bcpre = jnp.dot(xf_bf, w_bc_ref[l], preferred_element_type=jnp.float32)  # (BL, 256)
        dt    = jnp.dot(xf_bf, w_dt_ref[l], preferred_element_type=jnp.float32)  # (BL, H)

        # ---- causal depthwise conv1d (left zero pad) + SiLU, per channel group
        x_ssm = causal_conv_silu(xpre, conv_x_ref[l])       # (BL, 64)
        bc    = causal_conv_silu(bcpre, conv_bc_ref[l])     # (BL, 256)
        b_mat = bc[:, :D_STATE]                             # (BL, 128)
        c_mat = bc[:, D_STATE:]                             # (BL, 128)

        # ---- dt = softplus(dt + dt_bias);  A_head = -exp(A_log) precomputed
        hv = head_ref[l]                                    # (2, H): row0 dt_bias, row1 -exp(A_log)
        dtb = dt + hv[0:1, :]
        dt_sp = jnp.where(dtb > 20.0, dtb,
                          jnp.log(1.0 + jnp.exp(jnp.minimum(dtb, 20.0))))  # (BL, H)
        a_row = hv[1:2, :]                                  # (1, H), negative
        d_row = d_ref[l]                                    # (1, 64) per-channel D
        nrm_w = norm_ref[l]                                 # (1, 64)

        # ---- SSD (quadratic "masked attention" form), per batch element,
        #      decay computed per head, contraction on the MXU.
        y_rows = []
        for b in range(BB):
            sl = slice(b * L, (b + 1) * L)
            xs_b = x_ssm[sl]                                # (L, 64)
            dt_b = dt_sp[sl]                                # (L, H)
            cb = jax.lax.dot_general(                       # C @ B^T  (L, L)
                c_mat[sl].astype(jnp.bfloat16),
                b_mat[sl].astype(jnp.bfloat16),
                (((1,), (1,)), ((), ())),
                preferred_element_type=jnp.float32)
            # cumulative sums of dt*A per head (nonpositive): (L, H)
            cum = jnp.dot(tril_f, dt_b * a_row, preferred_element_type=jnp.float32)
            cumT = cum.T                                    # (H, L)
            y_parts = []
            for h in range(NHEADS):
                diff = cum[:, h:h + 1] - cumT[h:h + 1, :]   # (L, L), <= 0 on tril
                decay = jnp.exp(jnp.where(tril_b, diff, 0.0)) * tril_f
                g = decay * cb                              # (L, L)
                xdt_h = xs_b[:, h * P:(h + 1) * P] * dt_b[:, h:h + 1]   # (L, P)
                y_parts.append(jnp.dot(g, xdt_h, preferred_element_type=jnp.float32))
            y_rows.append(jnp.concatenate(y_parts, axis=-1))            # (L, 64)
        y = y_rows[0] if BB == 1 else jnp.concatenate(y_rows, axis=0)   # (BL, 64)
        y = y + d_row * x_ssm

        # ---- gated RMSNorm (rmsnorm(y * silu(z)) * w), then out_proj
        y = y * _silu(z)
        rstd = jax.lax.rsqrt(jnp.mean(y * y, axis=-1, keepdims=True) + EPS)
        y = (y * rstd * nrm_w).astype(jnp.bfloat16)
        xf = jnp.dot(y, w_out_ref[l], preferred_element_type=jnp.float32)  # (BL, 32)

    o_ref[...] = xf.reshape(BB, L, D).astype(o_ref.dtype)


# ----------------------------------------------------------------------------
# Wrapper: single pallas_call for the whole Decoder forward
# ----------------------------------------------------------------------------
def decoder_forward(enc_seq, mask, params):
    # slf_attn_mask = mask.unsqueeze(1).expand(-1, L, -1) is computed in the
    # reference but never consumed by the Mamba2 layer stack -> ignored here.
    del mask
    B, L, D = enc_seq.shape
    pos = params["position_enc"][:L, :]                    # (L, d_model)
    kp = params["kernel"]

    NB = 2 if (B >= 2 and B % 2 == 0) else 1               # keep both v7x TCs busy
    BB = B // NB

    full3 = lambda i: (0, 0, 0)
    full2 = lambda i: (0, 0)

    return pl.pallas_call(
        _decoder_kernel,
        out_shape=jax.ShapeDtypeStruct((B, L, D), jnp.float32),
        grid=(NB,),
        in_specs=[
            pl.BlockSpec((BB, L, D), lambda i: (i, 0, 0)),      # x (batch chunk)
            pl.BlockSpec(pos.shape, full2),                     # positional table
            pl.BlockSpec(kp["w_z"].shape, full3),               # in_proj z part
            pl.BlockSpec(kp["w_x"].shape, full3),               # in_proj x part
            pl.BlockSpec(kp["w_bc"].shape, full3),              # in_proj B|C part
            pl.BlockSpec(kp["w_dt"].shape, full3),              # in_proj dt part
            pl.BlockSpec(kp["conv_x"].shape, full3),            # conv taps+bias (x)
            pl.BlockSpec(kp["conv_bc"].shape, full3),           # conv taps+bias (B|C)
            pl.BlockSpec(kp["head"].shape, full3),              # dt_bias | -exp(A_log)
            pl.BlockSpec(kp["d_full"].shape, full3),            # per-channel D
            pl.BlockSpec(kp["norm_w"].shape, full3),            # RMSNorm weight
            pl.BlockSpec(kp["w_out"].shape, full3),             # out_proj
        ],
        out_specs=pl.BlockSpec((BB, L, D), lambda i: (i, 0, 0)),
        compiler_params=pltpu.CompilerParams(dimension_semantics=("parallel",)),
    )(enc_seq, pos, kp["w_z"], kp["w_x"], kp["w_bc"], kp["w_dt"],
      kp["conv_x"], kp["conv_bc"], kp["head"], kp["d_full"], kp["norm_w"],
      kp["w_out"])


# ----------------------------------------------------------------------------
# Glue: sinusoid table, deterministic parameter init, kernel-layout packing
# ----------------------------------------------------------------------------
def get_sinusoid_encoding_table(n_position, d_hid, padding_idx=None):
    def cal_angle(position, hid_idx):
        return position / np.power(10000, 2 * (hid_idx // 2) / d_hid)
    table = np.array([[cal_angle(p, j) for j in range(d_hid)]
                      for p in range(n_position)])
    table[:, 0::2] = np.sin(table[:, 0::2])
    table[:, 1::2] = np.cos(table[:, 1::2])
    if padding_idx is not None:
        table[padding_idx] = 0.0
    return jnp.asarray(table, dtype=jnp.float32)


def init_decoder_params(key):
    layers = []
    for i in range(N_LAYERS):
        k = jax.random.fold_in(key, i)
        k_in, k_conv, k_out = jax.random.split(k, 3)
        layers.append(dict(
            w_in=jax.random.normal(k_in, (D_MODEL, D_IN_PROJ), jnp.float32) * 0.05,
            conv_w=jax.random.normal(k_conv, (D_CONV, CONV_DIM), jnp.float32) * 0.2,
            conv_b=jnp.zeros((1, CONV_DIM), jnp.float32),
            dt_bias=(jnp.full((1, NHEADS), -1.0, jnp.float32)
                     + 0.1 * jnp.arange(NHEADS, dtype=jnp.float32)[None, :]),
            a_log=jnp.log(jnp.arange(1, NHEADS + 1, dtype=jnp.float32))[None, :],
            d=jnp.ones((1, NHEADS), jnp.float32),
            norm_w=jnp.ones((1, D_INNER), jnp.float32),
            w_out=jax.random.normal(k_out, (D_INNER, D_MODEL), jnp.float32) * 0.05,
        ))
    return dict(
        position_enc=get_sinusoid_encoding_table(LEN_MAX_SEQ + 1, D_MODEL),
        layers=layers,
    )


def pack_decoder_params(params):
    """Host-side re-layout: split in_proj at lane boundaries, pack conv w+b,
    hoist -exp(A_log) and per-channel D, cast matmul weights to bf16."""
    Ls = params["layers"]
    stack = lambda f: jnp.stack([f(p) for p in Ls], axis=0)
    return dict(
        w_z=stack(lambda p: p["w_in"][:, :D_INNER]).astype(jnp.bfloat16),
        w_x=stack(lambda p: p["w_in"][:, D_INNER:2 * D_INNER]).astype(jnp.bfloat16),
        w_bc=stack(lambda p: p["w_in"][:, 2 * D_INNER:2 * D_INNER + 2 * D_STATE]
                   ).astype(jnp.bfloat16),
        w_dt=stack(lambda p: p["w_in"][:, D_INNER + CONV_DIM:]).astype(jnp.bfloat16),
        conv_x=stack(lambda p: jnp.concatenate(
            [p["conv_w"][:, :D_INNER], p["conv_b"][:, :D_INNER]], axis=0)),
        conv_bc=stack(lambda p: jnp.concatenate(
            [p["conv_w"][:, D_INNER:], p["conv_b"][:, D_INNER:]], axis=0)),
        head=stack(lambda p: jnp.concatenate(
            [p["dt_bias"], -jnp.exp(p["a_log"])], axis=0)),
        d_full=stack(lambda p: jnp.repeat(p["d"], HEADDIM, axis=1)),
        norm_w=stack(lambda p: p["norm_w"]),
        w_out=stack(lambda p: p["w_out"]).astype(jnp.bfloat16),
    )


# ----------------------------------------------------------------------------
if __name__ == "__main__":
    key = jax.random.PRNGKey(0)
    k_x, k_p = jax.random.split(key)

    B, L = 2, 8
    enc_seq = jax.random.normal(k_x, (B, L, D_MODEL), jnp.float32)
    mask = jnp.zeros((B, L), jnp.int32)                    # unused downstream

    params = init_decoder_params(k_p)
    params["kernel"] = pack_decoder_params(params)

    out = decoder_forward(enc_seq, mask, params)
    out = jax.block_until_ready(out)

    assert out.shape == (B, L, D_MODEL)
    assert bool(jnp.all(jnp.isfinite(out)))
    print("KERNEL_OK")
</pallas_src>

<mosaic_0001>
module attributes {stable_mosaic.version = 11 : i64} {
  func.func @_decoder_kernel(%arg0: i32, %arg1: memref<1x8x32xf32, #tpu.memory_space<vmem>>, %arg2: memref<8x32xf32, #tpu.memory_space<vmem>>, %arg3: memref<2x32x64xbf16, #tpu.memory_space<vmem>>, %arg4: memref<2x32x64xbf16, #tpu.memory_space<vmem>>, %arg5: memref<2x32x256xbf16, #tpu.memory_space<vmem>>, %arg6: memref<2x32x4xbf16, #tpu.memory_space<vmem>>, %arg7: memref<2x4x64xf32, #tpu.memory_space<vmem>>, %arg8: memref<2x4x256xf32, #tpu.memory_space<vmem>>, %arg9: memref<2x2x4xf32, #tpu.memory_space<vmem>>, %arg10: memref<2x1x64xf32, #tpu.memory_space<vmem>>, %arg11: memref<2x1x64xf32, #tpu.memory_space<vmem>>, %arg12: memref<2x64x32xbf16, #tpu.memory_space<vmem>>, %arg13: memref<1x8x32xf32, #tpu.memory_space<vmem>>) attributes {dimension_semantics = [#tpu.dimension_semantics<parallel>], iteration_bounds = array<i64: 2>, scalar_prefetch = 0 : i64, scratch_operands = 0 : i64, tpu.core_type = #tpu.core_type<tc>, window_params = [{transform_indices = @transform_0, window_bounds = array<i64: 1, 8, 32>}, {pipeline_mode = #tpu.pipeline_mode<synchronous>, transform_indices = @transform_1, window_bounds = array<i64: 8, 32>}, {pipeline_mode = #tpu.pipeline_mode<synchronous>, transform_indices = @transform_2, window_bounds = array<i64: 2, 32, 64>}, {pipeline_mode = #tpu.pipeline_mode<synchronous>, transform_indices = @transform_3, window_bounds = array<i64: 2, 32, 64>}, {pipeline_mode = #tpu.pipeline_mode<synchronous>, transform_indices = @transform_4, window_bounds = array<i64: 2, 32, 256>}, {pipeline_mode = #tpu.pipeline_mode<synchronous>, transform_indices = @transform_5, window_bounds = array<i64: 2, 32, 4>}, {pipeline_mode = #tpu.pipeline_mode<synchronous>, transform_indices = @transform_6, window_bounds = array<i64: 2, 4, 64>}, {pipeline_mode = #tpu.pipeline_mode<synchronous>, transform_indices = @transform_7, window_bounds = array<i64: 2, 4, 256>}, {pipeline_mode = #tpu.pipeline_mode<synchronous>, transform_indices = @transform_8, window_bounds = array<i64: 2, 2, 4>}, {pipeline_mode = #tpu.pipeline_mode<synchronous>, transform_indices = @transform_9, window_bounds = array<i64: 2, 1, 64>}, {pipeline_mode = #tpu.pipeline_mode<synchronous>, transform_indices = @transform_10, window_bounds = array<i64: 2, 1, 64>}, {pipeline_mode = #tpu.pipeline_mode<synchronous>, transform_indices = @transform_11, window_bounds = array<i64: 2, 64, 32>}, {transform_indices = @transform_12, window_bounds = array<i64: 1, 8, 32>}]} {
    %c0 = arith.constant 0 : index
    %c0_0 = arith.constant 0 : index
    %c0_1 = arith.constant 0 : index
    %0 = vector.load %arg1[%c0, %c0_0, %c0_1] : memref<1x8x32xf32, #tpu.memory_space<vmem>>, vector<1x8x32xf32>
    %c0_2 = arith.constant 0 : index
    %c0_3 = arith.constant 0 : index
    %1 = vector.load %arg2[%c0_2, %c0_3] : memref<8x32xf32, #tpu.memory_space<vmem>>, vector<8x32xf32>
    %2 = vector.shape_cast %1 : vector<8x32xf32> to vector<1x8x32xf32>
    %3 = arith.addf %0, %2 : vector<1x8x32xf32>
    %4 = vector.shape_cast %3 : vector<1x8x32xf32> to vector<8x32xf32>
    %5 = tpu.iota {dimensions = array<i32: 0>} : vector<8x8xi32>
    %6 = tpu.iota {dimensions = array<i32: 1>} : vector<8x8xi32>
    %7 = arith.cmpi sge, %5, %6 : vector<8x8xi32>
    %8 = arith.extui %7 : vector<8x8xi1> to vector<8x8xi32>
    %9 = arith.sitofp %8 : vector<8x8xi32> to vector<8x8xf32>
    %10 = arith.truncf %4 : vector<8x32xf32> to vector<8x32xbf16>
    %c0_4 = arith.constant 0 : index
    %c0_5 = arith.constant 0 : index
    %c0_6 = arith.constant 0 : index
    %11 = vector.load %arg3[%c0_4, %c0_5, %c0_6] : memref<2x32x64xbf16, #tpu.memory_space<vmem>>, vector<1x32x64xbf16>
    %12 = vector.shape_cast %11 : vector<1x32x64xbf16> to vector<32x64xbf16>
    %cst = arith.constant dense<0.000000e+00> : vector<8x64xf32>
    %13 = tpu.matmul %10, %12, %cst {dimension_numbers = #tpu.dot_dimension_numbers<[1], [0], [0], [1], [0, 0, 1, 1], [], []>} : vector<8x32xbf16>, vector<32x64xbf16>, vector<8x64xf32> -> vector<8x64xf32>
    %c0_7 = arith.constant 0 : index
    %c0_8 = arith.constant 0 : index
    %c0_9 = arith.constant 0 : index
    %14 = vector.load %arg4[%c0_7, %c0_8, %c0_9] : memref<2x32x64xbf16, #tpu.memory_space<vmem>>, vector<1x32x64xbf16>
    %15 = vector.shape_cast %14 : vector<1x32x64xbf16> to vector<32x64xbf16>
    %cst_10 = arith.constant dense<0.000000e+00> : vector<8x64xf32>
    %16 = tpu.matmul %10, %15, %cst_10 {dimension_numbers = #tpu.dot_dimension_numbers<[1], [0], [0], [1], [0, 0, 1, 1], [], []>} : vector<8x32xbf16>, vector<32x64xbf16>, vector<8x64xf32> -> vector<8x64xf32>
    %c0_11 = arith.constant 0 : index
    %c0_12 = arith.constant 0 : index
    %c0_13 = arith.constant 0 : index
    %17 = vector.load %arg5[%c0_11, %c0_12, %c0_13] : memref<2x32x256xbf16, #tpu.memory_space<vmem>>, vector<1x32x256xbf16>
    %18 = vector.shape_cast %17 : vector<1x32x256xbf16> to vector<32x256xbf16>
    %cst_14 = arith.constant dense<0.000000e+00> : vector<8x256xf32>
    %19 = tpu.matmul %10, %18, %cst_14 {dimension_numbers = #tpu.dot_dimension_numbers<[1], [0], [0], [1], [0, 0, 1, 1], [], []>} : vector<8x32xbf16>, vector<32x256xbf16>, vector<8x256xf32> -> vector<8x256xf32>
    %c0_15 = arith.constant 0 : index
    %c0_16 = arith.constant 0 : index
    %c0_17 = arith.constant 0 : index
    %20 = vector.load %arg6[%c0_15, %c0_16, %c0_17] : memref<2x32x4xbf16, #tpu.memory_space<vmem>>, vector<1x32x4xbf16>
    %21 = vector.shape_cast %20 : vector<1x32x4xbf16> to vector<32x4xbf16>
    %cst_18 = arith.constant dense<0.000000e+00> : vector<8x4xf32>
    %22 = tpu.matmul %10, %21, %cst_18 {dimension_numbers = #tpu.dot_dimension_numbers<[1], [0], [0], [1], [0, 0, 1, 1], [], []>} : vector<8x32xbf16>, vector<32x4xbf16>, vector<8x4xf32> -> vector<8x4xf32>
    %c0_19 = arith.constant 0 : index
    %c0_20 = arith.constant 0 : index
    %c0_21 = arith.constant 0 : index
    %23 = vector.load %arg7[%c0_19, %c0_20, %c0_21] : memref<2x4x64xf32, #tpu.memory_space<vmem>>, vector<1x4x64xf32>
    %24 = vector.shape_cast %23 : vector<1x4x64xf32> to vector<4x64xf32>
    %25 = vector.extract_strided_slice %24 {offsets = [2, 0], sizes = [1, 64], strides = [1, 1]} : vector<4x64xf32> to vector<1x64xf32>
    %26 = vector.broadcast %25 : vector<1x64xf32> to vector<8x64xf32>
    %27 = arith.mulf %16, %26 : vector<8x64xf32>
    %cst_22 = arith.constant 0.000000e+00 : f32
    %28 = vector.broadcast %cst_22 : f32 to vector<1x64xf32>
    %29 = vector.extract_strided_slice %16 {offsets = [0, 0], sizes = [7, 64], strides = [1, 1]} : vector<8x64xf32> to vector<7x64xf32>
    %30 = tpu.concatenate %28, %29 in 0 : vector<1x64xf32>, vector<7x64xf32> -> vector<8x64xf32>
    %31 = vector.extract_strided_slice %24 {offsets = [1, 0], sizes = [1, 64], strides = [1, 1]} : vector<4x64xf32> to vector<1x64xf32>
    %32 = vector.broadcast %31 : vector<1x64xf32> to vector<8x64xf32>
    %33 = arith.mulf %30, %32 : vector<8x64xf32>
    %34 = arith.addf %27, %33 : vector<8x64xf32>
    %cst_23 = arith.constant 0.000000e+00 : f32
    %35 = vector.broadcast %cst_23 : f32 to vector<2x64xf32>
    %36 = vector.extract_strided_slice %16 {offsets = [0, 0], sizes = [6, 64], strides = [1, 1]} : vector<8x64xf32> to vector<6x64xf32>
    %37 = tpu.concatenate %35, %36 in 0 : vector<2x64xf32>, vector<6x64xf32> -> vector<8x64xf32>
    %38 = vector.extract_strided_slice %24 {offsets = [0, 0], sizes = [1, 64], strides = [1, 1]} : vector<4x64xf32> to vector<1x64xf32>
    %39 = vector.broadcast %38 : vector<1x64xf32> to vector<8x64xf32>
    %40 = arith.mulf %37, %39 : vector<8x64xf32>
    %41 = arith.addf %34, %40 : vector<8x64xf32>
    %42 = vector.extract_strided_slice %24 {offsets = [3, 0], sizes = [1, 64], strides = [1, 1]} : vector<4x64xf32> to vector<1x64xf32>
    %43 = vector.broadcast %42 : vector<1x64xf32> to vector<8x64xf32>
    %44 = arith.addf %41, %43 : vector<8x64xf32>
    %cst_24 = arith.constant 0.000000e+00 : f32
    %45 = vector.broadcast %cst_24 : f32 to vector<8x64xf32>
    %46 = arith.subf %45, %44 : vector<8x64xf32>
    %47 = math.exp %46 : vector<8x64xf32>
    %cst_25 = arith.constant 1.000000e+00 : f32
    %48 = vector.broadcast %cst_25 : f32 to vector<8x64xf32>
    %49 = arith.addf %48, %47 : vector<8x64xf32>
    %50 = arith.divf %44, %49 : vector<8x64xf32>
    %c0_26 = arith.constant 0 : index
    %c0_27 = arith.constant 0 : index
    %c0_28 = arith.constant 0 : index
    %51 = vector.load %arg8[%c0_26, %c0_27, %c0_28] : memref<2x4x256xf32, #tpu.memory_space<vmem>>, vector<1x4x256xf32>
    %52 = vector.shape_cast %51 : vector<1x4x256xf32> to vector<4x256xf32>
    %53 = vector.extract_strided_slice %52 {offsets = [2, 0], sizes = [1, 256], strides = [1, 1]} : vector<4x256xf32> to vector<1x256xf32>
    %54 = vector.broadcast %53 : vector<1x256xf32> to vector<8x256xf32>
    %55 = arith.mulf %19, %54 : vector<8x256xf32>
    %cst_29 = arith.constant 0.000000e+00 : f32
    %56 = vector.broadcast %cst_29 : f32 to vector<1x256xf32>
    %57 = vector.extract_strided_slice %19 {offsets = [0, 0], sizes = [7, 256], strides = [1, 1]} : vector<8x256xf32> to vector<7x256xf32>
    %58 = tpu.concatenate %56, %57 in 0 : vector<1x256xf32>, vector<7x256xf32> -> vector<8x256xf32>
    %59 = vector.extract_strided_slice %52 {offsets = [1, 0], sizes = [1, 256], strides = [1, 1]} : vector<4x256xf32> to vector<1x256xf32>
    %60 = vector.broadcast %59 : vector<1x256xf32> to vector<8x256xf32>
    %61 = arith.mulf %58, %60 : vector<8x256xf32>
    %62 = arith.addf %55, %61 : vector<8x256xf32>
    %cst_30 = arith.constant 0.000000e+00 : f32
    %63 = vector.broadcast %cst_30 : f32 to vector<2x256xf32>
    %64 = vector.extract_strided_slice %19 {offsets = [0, 0], sizes = [6, 256], strides = [1, 1]} : vector<8x256xf32> to vector<6x256xf32>
    %65 = tpu.concatenate %63, %64 in 0 : vector<2x256xf32>, vector<6x256xf32> -> vector<8x256xf32>
    %66 = vector.extract_strided_slice %52 {offsets = [0, 0], sizes = [1, 256], strides = [1, 1]} : vector<4x256xf32> to vector<1x256xf32>
    %67 = vector.broadcast %66 : vector<1x256xf32> to vector<8x256xf32>
    %68 = arith.mulf %65, %67 : vector<8x256xf32>
    %69 = arith.addf %62, %68 : vector<8x256xf32>
    %70 = vector.extract_strided_slice %52 {offsets = [3, 0], sizes = [1, 256], strides = [1, 1]} : vector<4x256xf32> to vector<1x256xf32>
    %71 = vector.broadcast %70 : vector<1x256xf32> to vector<8x256xf32>
    %72 = arith.addf %69, %71 : vector<8x256xf32>
    %cst_31 = arith.constant 0.000000e+00 : f32
    %73 = vector.broadcast %cst_31 : f32 to vector<8x256xf32>
    %74 = arith.subf %73, %72 : vector<8x256xf32>
    %75 = math.exp %74 : vector<8x256xf32>
    %cst_32 = arith.constant 1.000000e+00 : f32
    %76 = vector.broadcast %cst_32 : f32 to vector<8x256xf32>
    %77 = arith.addf %76, %75 : vector<8x256xf32>
    %78 = arith.divf %72, %77 : vector<8x256xf32>
    %79 = vector.extract_strided_slice %78 {offsets = [0, 0], sizes = [8, 128], strides = [1, 1]} : vector<8x256xf32> to vector<8x128xf32>
    %80 = vector.extract_strided_slice %78 {offsets = [0, 128], sizes = [8, 128], strides = [1, 1]} : vector<8x256xf32> to vector<8x128xf32>
    %c0_33 = arith.constant 0 : index
    %c0_34 = arith.constant 0 : index
    %c0_35 = arith.constant 0 : index
    %81 = vector.load %arg9[%c0_33, %c0_34, %c0_35] : memref<2x2x4xf32, #tpu.memory_space<vmem>>, vector<1x2x4xf32>
    %82 = vector.shape_cast %81 : vector<1x2x4xf32> to vector<2x4xf32>
    %83 = vector.extract_strided_slice %82 {offsets = [0, 0], sizes = [1, 4], strides = [1, 1]} : vector<2x4xf32> to vector<1x4xf32>
    %84 = vector.broadcast %83 : vector<1x4xf32> to vector<8x4xf32>
    %85 = arith.addf %22, %84 : vector<8x4xf32>
    %cst_36 = arith.constant 2.000000e+01 : f32
    %86 = vector.broadcast %cst_36 : f32 to vector<8x4xf32>
    %87 = arith.cmpf ogt, %85, %86 : vector<8x4xf32>
    %cst_37 = arith.constant 2.000000e+01 : f32
    %88 = vector.broadcast %cst_37 : f32 to vector<8x4xf32>
    %89 = arith.minimumf %85, %88 : vector<8x4xf32>
    %90 = math.exp %89 : vector<8x4xf32>
    %cst_38 = arith.constant 1.000000e+00 : f32
    %91 = vector.broadcast %cst_38 : f32 to vector<8x4xf32>
    %92 = arith.addf %91, %90 : vector<8x4xf32>
    %93 = math.log %92 : vector<8x4xf32>
    %94 = arith.select %87, %85, %93 : vector<8x4xi1>, vector<8x4xf32>
    %95 = vector.extract_strided_slice %82 {offsets = [1, 0], sizes = [1, 4], strides = [1, 1]} : vector<2x4xf32> to vector<1x4xf32>
    %c0_39 = arith.constant 0 : index
    %c0_40 = arith.constant 0 : index
    %c0_41 = arith.constant 0 : index
    %96 = vector.load %arg10[%c0_39, %c0_40, %c0_41] : memref<2x1x64xf32, #tpu.memory_space<vmem>>, vector<1x1x64xf32>
    %97 = vector.shape_cast %96 : vector<1x1x64xf32> to vector<1x64xf32>
    %c0_42 = arith.constant 0 : index
    %c0_43 = arith.constant 0 : index
    %c0_44 = arith.constant 0 : index
    %98 = vector.load %arg11[%c0_42, %c0_43, %c0_44] : memref<2x1x64xf32, #tpu.memory_space<vmem>>, vector<1x1x64xf32>
    %99 = vector.shape_cast %98 : vector<1x1x64xf32> to vector<1x64xf32>
    %100 = arith.truncf %80 : vector<8x128xf32> to vector<8x128xbf16>
    %101 = arith.truncf %79 : vector<8x128xf32> to vector<8x128xbf16>
    %cst_45 = arith.constant dense<0.000000e+00> : vector<8x8xf32>
    %102 = tpu.matmul %100, %101, %cst_45 {dimension_numbers = #tpu.dot_dimension_numbers<[1], [1], [0], [0], [0, 0, 1, 0], [], []>} : vector<8x128xbf16>, vector<8x128xbf16>, vector<8x8xf32> -> vector<8x8xf32>
    %103 = vector.broadcast %95 : vector<1x4xf32> to vector<8x4xf32>
    %104 = arith.mulf %94, %103 : vector<8x4xf32>
    %cst_46 = arith.constant dense<0.000000e+00> : vector<8x4xf32>
    %105 = tpu.matmul %9, %104, %cst_46 {dimension_numbers = #tpu.dot_dimension_numbers<[1], [0], [0], [1], [0, 0, 1, 1], [], []>} : vector<8x8xf32>, vector<8x4xf32>, vector<8x4xf32> -> vector<8x4xf32>
    %106 = tpu.transpose %105, [1, 0] : vector<8x4xf32> -> vector<4x8xf32>
    %107 = vector.extract_strided_slice %105 {offsets = [0, 0], sizes = [8, 1], strides = [1, 1]} : vector<8x4xf32> to vector<8x1xf32>
    %108 = vector.extract_strided_slice %106 {offsets = [0, 0], sizes = [1, 8], strides = [1, 1]} : vector<4x8xf32> to vector<1x8xf32>
    %109 = vector.broadcast %107 : vector<8x1xf32> to vector<8x8xf32>
    %110 = vector.broadcast %108 : vector<1x8xf32> to vector<8x8xf32>
    %111 = arith.subf %109, %110 : vector<8x8xf32>
    %cst_47 = arith.constant 0.000000e+00 : f32
    %112 = vector.broadcast %cst_47 : f32 to vector<8x8xf32>
    %113 = arith.select %7, %111, %112 : vector<8x8xi1>, vector<8x8xf32>
    %114 = math.exp %113 : vector<8x8xf32>
    %115 = arith.mulf %114, %9 : vector<8x8xf32>
    %116 = arith.mulf %115, %102 : vector<8x8xf32>
    %117 = vector.extract_strided_slice %50 {offsets = [0, 0], sizes = [8, 16], strides = [1, 1]} : vector<8x64xf32> to vector<8x16xf32>
    %118 = vector.extract_strided_slice %94 {offsets = [0, 0], sizes = [8, 1], strides = [1, 1]} : vector<8x4xf32> to vector<8x1xf32>
    %119 = vector.broadcast %118 : vector<8x1xf32> to vector<8x16xf32>
    %120 = arith.mulf %117, %119 : vector<8x16xf32>
    %cst_48 = arith.constant dense<0.000000e+00> : vector<8x16xf32>
    %121 = tpu.matmul %116, %120, %cst_48 {dimension_numbers = #tpu.dot_dimension_numbers<[1], [0], [0], [1], [0, 0, 1, 1], [], []>} : vector<8x8xf32>, vector<8x16xf32>, vector<8x16xf32> -> vector<8x16xf32>
    %122 = vector.extract_strided_slice %105 {offsets = [0, 1], sizes = [8, 1], strides = [1, 1]} : vector<8x4xf32> to vector<8x1xf32>
    %123 = vector.extract_strided_slice %106 {offsets = [1, 0], sizes = [1, 8], strides = [1, 1]} : vector<4x8xf32> to vector<1x8xf32>
    %124 = vector.broadcast %122 : vector<8x1xf32> to vector<8x8xf32>
    %125 = vector.broadcast %123 : vector<1x8xf32> to vector<8x8xf32>
    %126 = arith.subf %124, %125 : vector<8x8xf32>
    %cst_49 = arith.constant 0.000000e+00 : f32
    %127 = vector.broadcast %cst_49 : f32 to vector<8x8xf32>
    %128 = arith.select %7, %126, %127 : vector<8x8xi1>, vector<8x8xf32>
    %129 = math.exp %128 : vector<8x8xf32>
    %130 = arith.mulf %129, %9 : vector<8x8xf32>
    %131 = arith.mulf %130, %102 : vector<8x8xf32>
    %132 = vector.extract_strided_slice %50 {offsets = [0, 16], sizes = [8, 16], strides = [1, 1]} : vector<8x64xf32> to vector<8x16xf32>
    %133 = vector.extract_strided_slice %94 {offsets = [0, 1], sizes = [8, 1], strides = [1, 1]} : vector<8x4xf32> to vector<8x1xf32>
    %134 = vector.broadcast %133 : vector<8x1xf32> to vector<8x16xf32>
    %135 = arith.mulf %132, %134 : vector<8x16xf32>
    %cst_50 = arith.constant dense<0.000000e+00> : vector<8x16xf32>
    %136 = tpu.matmul %131, %135, %cst_50 {dimension_numbers = #tpu.dot_dimension_numbers<[1], [0], [0], [1], [0, 0, 1, 1], [], []>} : vector<8x8xf32>, vector<8x16xf32>, vector<8x16xf32> -> vector<8x16xf32>
    %137 = vector.extract_strided_slice %105 {offsets = [0, 2], sizes = [8, 1], strides = [1, 1]} : vector<8x4xf32> to vector<8x1xf32>
    %138 = vector.extract_strided_slice %106 {offsets = [2, 0], sizes = [1, 8], strides = [1, 1]} : vector<4x8xf32> to vector<1x8xf32>
    %139 = vector.broadcast %137 : vector<8x1xf32> to vector<8x8xf32>
    %140 = vector.broadcast %138 : vector<1x8xf32> to vector<8x8xf32>
    %141 = arith.subf %139, %140 : vector<8x8xf32>
    %cst_51 = arith.constant 0.000000e+00 : f32
    %142 = vector.broadcast %cst_51 : f32 to vector<8x8xf32>
    %143 = arith.select %7, %141, %142 : vector<8x8xi1>, vector<8x8xf32>
    %144 = math.exp %143 : vector<8x8xf32>
    %145 = arith.mulf %144, %9 : vector<8x8xf32>
    %146 = arith.mulf %145, %102 : vector<8x8xf32>
    %147 = vector.extract_strided_slice %50 {offsets = [0, 32], sizes = [8, 16], strides = [1, 1]} : vector<8x64xf32> to vector<8x16xf32>
    %148 = vector.extract_strided_slice %94 {offsets = [0, 2], sizes = [8, 1], strides = [1, 1]} : vector<8x4xf32> to vector<8x1xf32>
    %149 = vector.broadcast %148 : vector<8x1xf32> to vector<8x16xf32>
    %150 = arith.mulf %147, %149 : vector<8x16xf32>
    %cst_52 = arith.constant dense<0.000000e+00> : vector<8x16xf32>
    %151 = tpu.matmul %146, %150, %cst_52 {dimension_numbers = #tpu.dot_dimension_numbers<[1], [0], [0], [1], [0, 0, 1, 1], [], []>} : vector<8x8xf32>, vector<8x16xf32>, vector<8x16xf32> -> vector<8x16xf32>
    %152 = vector.extract_strided_slice %105 {offsets = [0, 3], sizes = [8, 1], strides = [1, 1]} : vector<8x4xf32> to vector<8x1xf32>
    %153 = vector.extract_strided_slice %106 {offsets = [3, 0], sizes = [1, 8], strides = [1, 1]} : vector<4x8xf32> to vector<1x8xf32>
    %154 = vector.broadcast %152 : vector<8x1xf32> to vector<8x8xf32>
    %155 = vector.broadcast %153 : vector<1x8xf32> to vector<8x8xf32>
    %156 = arith.subf %154, %155 : vector<8x8xf32>
    %cst_53 = arith.constant 0.000000e+00 : f32
    %157 = vector.broadcast %cst_53 : f32 to vector<8x8xf32>
    %158 = arith.select %7, %156, %157 : vector<8x8xi1>, vector<8x8xf32>
    %159 = math.exp %158 : vector<8x8xf32>
    %160 = arith.mulf %159, %9 : vector<8x8xf32>
    %161 = arith.mulf %160, %102 : vector<8x8xf32>
    %162 = vector.extract_strided_slice %50 {offsets = [0, 48], sizes = [8, 16], strides = [1, 1]} : vector<8x64xf32> to vector<8x16xf32>
    %163 = vector.extract_strided_slice %94 {offsets = [0, 3], sizes = [8, 1], strides = [1, 1]} : vector<8x4xf32> to vector<8x1xf32>
    %164 = vector.broadcast %163 : vector<8x1xf32> to vector<8x16xf32>
    %165 = arith.mulf %162, %164 : vector<8x16xf32>
    %cst_54 = arith.constant dense<0.000000e+00> : vector<8x16xf32>
    %166 = tpu.matmul %161, %165, %cst_54 {dimension_numbers = #tpu.dot_dimension_numbers<[1], [0], [0], [1], [0, 0, 1, 1], [], []>} : vector<8x8xf32>, vector<8x16xf32>, vector<8x16xf32> -> vector<8x16xf32>
    %167 = tpu.concatenate %121, %136, %151, %166 in 1 : vector<8x16xf32>, vector<8x16xf32>, vector<8x16xf32>, vector<8x16xf32> -> vector<8x64xf32>
    %168 = vector.broadcast %97 : vector<1x64xf32> to vector<8x64xf32>
    %169 = arith.mulf %168, %50 : vector<8x64xf32>
    %170 = arith.addf %167, %169 : vector<8x64xf32>
    %cst_55 = arith.constant 0.000000e+00 : f32
    %171 = vector.broadcast %cst_55 : f32 to vector<8x64xf32>
    %172 = arith.subf %171, %13 : vector<8x64xf32>
    %173 = math.exp %172 : vector<8x64xf32>
    %cst_56 = arith.constant 1.000000e+00 : f32
    %174 = vector.broadcast %cst_56 : f32 to vector<8x64xf32>
    %175 = arith.addf %174, %173 : vector<8x64xf32>
    %176 = arith.divf %13, %175 : vector<8x64xf32>
    %177 = arith.mulf %170, %176 : vector<8x64xf32>
    %178 = arith.mulf %177, %177 : vector<8x64xf32>
    %cst_57 = arith.constant dense<0.000000e+00> : vector<8xf32>
    %179 = vector.multi_reduction <add>, %178, %cst_57 [1] : vector<8x64xf32> to vector<8xf32>
    %180 = vector.shape_cast %179 : vector<8xf32> to vector<8x1xf32>
    %cst_58 = arith.constant 6.400000e+01 : f32
    %181 = vector.broadcast %cst_58 : f32 to vector<8x1xf32>
    %182 = arith.divf %180, %181 : vector<8x1xf32>
    %cst_59 = arith.constant 9.99999974E-6 : f32
    %183 = vector.broadcast %cst_59 : f32 to vector<8x1xf32>
    %184 = arith.addf %182, %183 : vector<8x1xf32>
    %185 = math.rsqrt %184 : vector<8x1xf32>
    %186 = vector.broadcast %185 : vector<8x1xf32> to vector<8x64xf32>
    %187 = arith.mulf %177, %186 : vector<8x64xf32>
    %188 = vector.broadcast %99 : vector<1x64xf32> to vector<8x64xf32>
    %189 = arith.mulf %187, %188 : vector<8x64xf32>
    %190 = arith.truncf %189 : vector<8x64xf32> to vector<8x64xbf16>
    %c0_60 = arith.constant 0 : index
    %c0_61 = arith.constant 0 : index
    %c0_62 = arith.constant 0 : index
    %191 = vector.load %arg12[%c0_60, %c0_61, %c0_62] : memref<2x64x32xbf16, #tpu.memory_space<vmem>>, vector<1x64x32xbf16>
    %192 = vector.shape_cast %191 : vector<1x64x32xbf16> to vector<64x32xbf16>
    %cst_63 = arith.constant dense<0.000000e+00> : vector<8x32xf32>
    %193 = tpu.matmul %190, %192, %cst_63 {dimension_numbers = #tpu.dot_dimension_numbers<[1], [0], [0], [1], [0, 0, 1, 1], [], []>} : vector<8x64xbf16>, vector<64x32xbf16>, vector<8x32xf32> -> vector<8x32xf32>
    %194 = arith.truncf %193 : vector<8x32xf32> to vector<8x32xbf16>
    %c1 = arith.constant 1 : index
    %c0_64 = arith.constant 0 : index
    %c0_65 = arith.constant 0 : index
    %195 = vector.load %arg3[%c1, %c0_64, %c0_65] : memref<2x32x64xbf16, #tpu.memory_space<vmem>>, vector<1x32x64xbf16>
    %196 = vector.shape_cast %195 : vector<1x32x64xbf16> to vector<32x64xbf16>
    %cst_66 = arith.constant dense<0.000000e+00> : vector<8x64xf32>
    %197 = tpu.matmul %194, %196, %cst_66 {dimension_numbers = #tpu.dot_dimension_numbers<[1], [0], [0], [1], [0, 0, 1, 1], [], []>} : vector<8x32xbf16>, vector<32x64xbf16>, vector<8x64xf32> -> vector<8x64xf32>
    %c1_67 = arith.constant 1 : index
    %c0_68 = arith.constant 0 : index
    %c0_69 = arith.constant 0 : index
    %198 = vector.load %arg4[%c1_67, %c0_68, %c0_69] : memref<2x32x64xbf16, #tpu.memory_space<vmem>>, vector<1x32x64xbf16>
    %199 = vector.shape_cast %198 : vector<1x32x64xbf16> to vector<32x64xbf16>
    %cst_70 = arith.constant dense<0.000000e+00> : vector<8x64xf32>
    %200 = tpu.matmul %194, %199, %cst_70 {dimension_numbers = #tpu.dot_dimension_numbers<[1], [0], [0], [1], [0, 0, 1, 1], [], []>} : vector<8x32xbf16>, vector<32x64xbf16>, vector<8x64xf32> -> vector<8x64xf32>
    %c1_71 = arith.constant 1 : index
    %c0_72 = arith.constant 0 : index
    %c0_73 = arith.constant 0 : index
    %201 = vector.load %arg5[%c1_71, %c0_72, %c0_73] : memref<2x32x256xbf16, #tpu.memory_space<vmem>>, vector<1x32x256xbf16>
    %202 = vector.shape_cast %201 : vector<1x32x256xbf16> to vector<32x256xbf16>
    %cst_74 = arith.constant dense<0.000000e+00> : vector<8x256xf32>
    %203 = tpu.matmul %194, %202, %cst_74 {dimension_numbers = #tpu.dot_dimension_numbers<[1], [0], [0], [1], [0, 0, 1, 1], [], []>} : vector<8x32xbf16>, vector<32x256xbf16>, vector<8x256xf32> -> vector<8x256xf32>
    %c1_75 = arith.constant 1 : index
    %c0_76 = arith.constant 0 : index
    %c0_77 = arith.constant 0 : index
    %204 = vector.load %arg6[%c1_75, %c0_76, %c0_77] : memref<2x32x4xbf16, #tpu.memory_space<vmem>>, vector<1x32x4xbf16>
    %205 = vector.shape_cast %204 : vector<1x32x4xbf16> to vector<32x4xbf16>
    %cst_78 = arith.constant dense<0.000000e+00> : vector<8x4xf32>
    %206 = tpu.matmul %194, %205, %cst_78 {dimension_numbers = #tpu.dot_dimension_numbers<[1], [0], [0], [1], [0, 0, 1, 1], [], []>} : vector<8x32xbf16>, vector<32x4xbf16>, vector<8x4xf32> -> vector<8x4xf32>
    %c1_79 = arith.constant 1 : index
    %c0_80 = arith.constant 0 : index
    %c0_81 = arith.constant 0 : index
    %207 = vector.load %arg7[%c1_79, %c0_80, %c0_81] : memref<2x4x64xf32, #tpu.memory_space<vmem>>, vector<1x4x64xf32>
    %208 = vector.shape_cast %207 : vector<1x4x64xf32> to vector<4x64xf32>
    %209 = vector.extract_strided_slice %208 {offsets = [2, 0], sizes = [1, 64], strides = [1, 1]} : vector<4x64xf32> to vector<1x64xf32>
    %210 = vector.broadcast %209 : vector<1x64xf32> to vector<8x64xf32>
    %211 = arith.mulf %200, %210 : vector<8x64xf32>
    %cst_82 = arith.constant 0.000000e+00 : f32
    %212 = vector.broadcast %cst_82 : f32 to vector<1x64xf32>
    %213 = vector.extract_strided_slice %200 {offsets = [0, 0], sizes = [7, 64], strides = [1, 1]} : vector<8x64xf32> to vector<7x64xf32>
    %214 = tpu.concatenate %212, %213 in 0 : vector<1x64xf32>, vector<7x64xf32> -> vector<8x64xf32>
    %215 = vector.extract_strided_slice %208 {offsets = [1, 0], sizes = [1, 64], strides = [1, 1]} : vector<4x64xf32> to vector<1x64xf32>
    %216 = vector.broadcast %215 : vector<1x64xf32> to vector<8x64xf32>
    %217 = arith.mulf %214, %216 : vector<8x64xf32>
    %218 = arith.addf %211, %217 : vector<8x64xf32>
    %cst_83 = arith.constant 0.000000e+00 : f32
    %219 = vector.broadcast %cst_83 : f32 to vector<2x64xf32>
    %220 = vector.extract_strided_slice %200 {offsets = [0, 0], sizes = [6, 64], strides = [1, 1]} : vector<8x64xf32> to vector<6x64xf32>
    %221 = tpu.concatenate %219, %220 in 0 : vector<2x64xf32>, vector<6x64xf32> -> vector<8x64xf32>
    %222 = vector.extract_strided_slice %208 {offsets = [0, 0], sizes = [1, 64], strides = [1, 1]} : vector<4x64xf32> to vector<1x64xf32>
    %223 = vector.broadcast %222 : vector<1x64xf32> to vector<8x64xf32>
    %224 = arith.mulf %221, %223 : vector<8x64xf32>
    %225 = arith.addf %218, %224 : vector<8x64xf32>
    %226 = vector.extract_strided_slice %208 {offsets = [3, 0], sizes = [1, 64], strides = [1, 1]} : vector<4x64xf32> to vector<1x64xf32>
    %227 = vector.broadcast %226 : vector<1x64xf32> to vector<8x64xf32>
    %228 = arith.addf %225, %227 : vector<8x64xf32>
    %cst_84 = arith.constant 0.000000e+00 : f32
    %229 = vector.broadcast %cst_84 : f32 to vector<8x64xf32>
    %230 = arith.subf %229, %228 : vector<8x64xf32>
    %231 = math.exp %230 : vector<8x64xf32>
    %cst_85 = arith.constant 1.000000e+00 : f32
    %232 = vector.broadcast %cst_85 : f32 to vector<8x64xf32>
    %233 = arith.addf %232, %231 : vector<8x64xf32>
    %234 = arith.divf %228, %233 : vector<8x64xf32>
    %c1_86 = arith.constant 1 : index
    %c0_87 = arith.constant 0 : index
    %c0_88 = arith.constant 0 : index
    %235 = vector.load %arg8[%c1_86, %c0_87, %c0_88] : memref<2x4x256xf32, #tpu.memory_space<vmem>>, vector<1x4x256xf32>
    %236 = vector.shape_cast %235 : vector<1x4x256xf32> to vector<4x256xf32>
    %237 = vector.extract_strided_slice %236 {offsets = [2, 0], sizes = [1, 256], strides = [1, 1]} : vector<4x256xf32> to vector<1x256xf32>
    %238 = vector.broadcast %237 : vector<1x256xf32> to vector<8x256xf32>
    %239 = arith.mulf %203, %238 : vector<8x256xf32>
    %cst_89 = arith.constant 0.000000e+00 : f32
    %240 = vector.broadcast %cst_89 : f32 to vector<1x256xf32>
    %241 = vector.extract_strided_slice %203 {offsets = [0, 0], sizes = [7, 256], strides = [1, 1]} : vector<8x256xf32> to vector<7x256xf32>
    %242 = tpu.concatenate %240, %241 in 0 : vector<1x256xf32>, vector<7x256xf32> -> vector<8x256xf32>
    %243 = vector.extract_strided_slice %236 {offsets = [1, 0], sizes = [1, 256], strides = [1, 1]} : vector<4x256xf32> to vector<1x256xf32>
    %244 = vector.broadcast %243 : vector<1x256xf32> to vector<8x256xf32>
    %245 = arith.mulf %242, %244 : vector<8x256xf32>
    %246 = arith.addf %239, %245 : vector<8x256xf32>
    %cst_90 = arith.constant 0.000000e+00 : f32
    %247 = vector.broadcast %cst_90 : f32 to vector<2x256xf32>
    %248 = vector.extract_strided_slice %203 {offsets = [0, 0], sizes = [6, 256], strides = [1, 1]} : vector<8x256xf32> to vector<6x256xf32>
    %249 = tpu.concatenate %247, %248 in 0 : vector<2x256xf32>, vector<6x256xf32> -> vector<8x256xf32>
    %250 = vector.extract_strided_slice %236 {offsets = [0, 0], sizes = [1, 256], strides = [1, 1]} : vector<4x256xf32> to vector<1x256xf32>
    %251 = vector.broadcast %250 : vector<1x256xf32> to vector<8x256xf32>
    %252 = arith.mulf %249, %251 : vector<8x256xf32>
    %253 = arith.addf %246, %252 : vector<8x256xf32>
    %254 = vector.extract_strided_slice %236 {offsets = [3, 0], sizes = [1, 256], strides = [1, 1]} : vector<4x256xf32> to vector<1x256xf32>
    %255 = vector.broadcast %254 : vector<1x256xf32> to vector<8x256xf32>
    %256 = arith.addf %253, %255 : vector<8x256xf32>
    %cst_91 = arith.constant 0.000000e+00 : f32
    %257 = vector.broadcast %cst_91 : f32 to vector<8x256xf32>
    %258 = arith.subf %257, %256 : vector<8x256xf32>
    %259 = math.exp %258 : vector<8x256xf32>
    %cst_92 = arith.constant 1.000000e+00 : f32
    %260 = vector.broadcast %cst_92 : f32 to vector<8x256xf32>
    %261 = arith.addf %260, %259 : vector<8x256xf32>
    %262 = arith.divf %256, %261 : vector<8x256xf32>
    %263 = vector.extract_strided_slice %262 {offsets = [0, 0], sizes = [8, 128], strides = [1, 1]} : vector<8x256xf32> to vector<8x128xf32>
    %264 = vector.extract_strided_slice %262 {offsets = [0, 128], sizes = [8, 128], strides = [1, 1]} : vector<8x256xf32> to vector<8x128xf32>
    %c1_93 = arith.constant 1 : index
    %c0_94 = arith.constant 0 : index
    %c0_95 = arith.constant 0 : index
    %265 = vector.load %arg9[%c1_93, %c0_94, %c0_95] : memref<2x2x4xf32, #tpu.memory_space<vmem>>, vector<1x2x4xf32>
    %266 = vector.shape_cast %265 : vector<1x2x4xf32> to vector<2x4xf32>
    %267 = vector.extract_strided_slice %266 {offsets = [0, 0], sizes = [1, 4], strides = [1, 1]} : vector<2x4xf32> to vector<1x4xf32>
    %268 = vector.broadcast %267 : vector<1x4xf32> to vector<8x4xf32>
    %269 = arith.addf %206, %268 : vector<8x4xf32>
    %cst_96 = arith.constant 2.000000e+01 : f32
    %270 = vector.broadcast %cst_96 : f32 to vector<8x4xf32>
    %271 = arith.cmpf ogt, %269, %270 : vector<8x4xf32>
    %cst_97 = arith.constant 2.000000e+01 : f32
    %272 = vector.broadcast %cst_97 : f32 to vector<8x4xf32>
    %273 = arith.minimumf %269, %272 : vector<8x4xf32>
    %274 = math.exp %273 : vector<8x4xf32>
    %cst_98 = arith.constant 1.000000e+00 : f32
    %275 = vector.broadcast %cst_98 : f32 to vector<8x4xf32>
    %276 = arith.addf %275, %274 : vector<8x4xf32>
    %277 = math.log %276 : vector<8x4xf32>
    %278 = arith.select %271, %269, %277 : vector<8x4xi1>, vector<8x4xf32>
    %279 = vector.extract_strided_slice %266 {offsets = [1, 0], sizes = [1, 4], strides = [1, 1]} : vector<2x4xf32> to vector<1x4xf32>
    %c1_99 = arith.constant 1 : index
    %c0_100 = arith.constant 0 : index
    %c0_101 = arith.constant 0 : index
    %280 = vector.load %arg10[%c1_99, %c0_100, %c0_101] : memref<2x1x64xf32, #tpu.memory_space<vmem>>, vector<1x1x64xf32>
    %281 = vector.shape_cast %280 : vector<1x1x64xf32> to vector<1x64xf32>
    %c1_102 = arith.constant 1 : index
    %c0_103 = arith.constant 0 : index
    %c0_104 = arith.constant 0 : index
    %282 = vector.load %arg11[%c1_102, %c0_103, %c0_104] : memref<2x1x64xf32, #tpu.memory_space<vmem>>, vector<1x1x64xf32>
    %283 = vector.shape_cast %282 : vector<1x1x64xf32> to vector<1x64xf32>
    %284 = arith.truncf %264 : vector<8x128xf32> to vector<8x128xbf16>
    %285 = arith.truncf %263 : vector<8x128xf32> to vector<8x128xbf16>
    %cst_105 = arith.constant dense<0.000000e+00> : vector<8x8xf32>
    %286 = tpu.matmul %284, %285, %cst_105 {dimension_numbers = #tpu.dot_dimension_numbers<[1], [1], [0], [0], [0, 0, 1, 0], [], []>} : vector<8x128xbf16>, vector<8x128xbf16>, vector<8x8xf32> -> vector<8x8xf32>
    %287 = vector.broadcast %279 : vector<1x4xf32> to vector<8x4xf32>
    %288 = arith.mulf %278, %287 : vector<8x4xf32>
    %cst_106 = arith.constant dense<0.000000e+00> : vector<8x4xf32>
    %289 = tpu.matmul %9, %288, %cst_106 {dimension_numbers = #tpu.dot_dimension_numbers<[1], [0], [0], [1], [0, 0, 1, 1], [], []>} : vector<8x8xf32>, vector<8x4xf32>, vector<8x4xf32> -> vector<8x4xf32>
    %290 = tpu.transpose %289, [1, 0] : vector<8x4xf32> -> vector<4x8xf32>
    %291 = vector.extract_strided_slice %289 {offsets = [0, 0], sizes = [8, 1], strides = [1, 1]} : vector<8x4xf32> to vector<8x1xf32>
    %292 = vector.extract_strided_slice %290 {offsets = [0, 0], sizes = [1, 8], strides = [1, 1]} : vector<4x8xf32> to vector<1x8xf32>
    %293 = vector.broadcast %291 : vector<8x1xf32> to vector<8x8xf32>
    %294 = vector.broadcast %292 : vector<1x8xf32> to vector<8x8xf32>
    %295 = arith.subf %293, %294 : vector<8x8xf32>
    %cst_107 = arith.constant 0.000000e+00 : f32
    %296 = vector.broadcast %cst_107 : f32 to vector<8x8xf32>
    %297 = arith.select %7, %295, %296 : vector<8x8xi1>, vector<8x8xf32>
    %298 = math.exp %297 : vector<8x8xf32>
    %299 = arith.mulf %298, %9 : vector<8x8xf32>
    %300 = arith.mulf %299, %286 : vector<8x8xf32>
    %301 = vector.extract_strided_slice %234 {offsets = [0, 0], sizes = [8, 16], strides = [1, 1]} : vector<8x64xf32> to vector<8x16xf32>
    %302 = vector.extract_strided_slice %278 {offsets = [0, 0], sizes = [8, 1], strides = [1, 1]} : vector<8x4xf32> to vector<8x1xf32>
    %303 = vector.broadcast %302 : vector<8x1xf32> to vector<8x16xf32>
    %304 = arith.mulf %301, %303 : vector<8x16xf32>
    %cst_108 = arith.constant dense<0.000000e+00> : vector<8x16xf32>
    %305 = tpu.matmul %300, %304, %cst_108 {dimension_numbers = #tpu.dot_dimension_numbers<[1], [0], [0], [1], [0, 0, 1, 1], [], []>} : vector<8x8xf32>, vector<8x16xf32>, vector<8x16xf32> -> vector<8x16xf32>
    %306 = vector.extract_strided_slice %289 {offsets = [0, 1], sizes = [8, 1], strides = [1, 1]} : vector<8x4xf32> to vector<8x1xf32>
    %307 = vector.extract_strided_slice %290 {offsets = [1, 0], sizes = [1, 8], strides = [1, 1]} : vector<4x8xf32> to vector<1x8xf32>
    %308 = vector.broadcast %306 : vector<8x1xf32> to vector<8x8xf32>
    %309 = vector.broadcast %307 : vector<1x8xf32> to vector<8x8xf32>
    %310 = arith.subf %308, %309 : vector<8x8xf32>
    %cst_109 = arith.constant 0.000000e+00 : f32
    %311 = vector.broadcast %cst_109 : f32 to vector<8x8xf32>
    %312 = arith.select %7, %310, %311 : vector<8x8xi1>, vector<8x8xf32>
    %313 = math.exp %312 : vector<8x8xf32>
    %314 = arith.mulf %313, %9 : vector<8x8xf32>
    %315 = arith.mulf %314, %286 : vector<8x8xf32>
    %316 = vector.extract_strided_slice %234 {offsets = [0, 16], sizes = [8, 16], strides = [1, 1]} : vector<8x64xf32> to vector<8x16xf32>
    %317 = vector.extract_strided_slice %278 {offsets = [0, 1], sizes = [8, 1], strides = [1, 1]} : vector<8x4xf32> to vector<8x1xf32>
    %318 = vector.broadcast %317 : vector<8x1xf32> to vector<8x16xf32>
    %319 = arith.mulf %316, %318 : vector<8x16xf32>
    %cst_110 = arith.constant dense<0.000000e+00> : vector<8x16xf32>
    %320 = tpu.matmul %315, %319, %cst_110 {dimension_numbers = #tpu.dot_dimension_numbers<[1], [0], [0], [1], [0, 0, 1, 1], [], []>} : vector<8x8xf32>, vector<8x16xf32>, vector<8x16xf32> -> vector<8x16xf32>
    %321 = vector.extract_strided_slice %289 {offsets = [0, 2], sizes = [8, 1], strides = [1, 1]} : vector<8x4xf32> to vector<8x1xf32>
    %322 = vector.extract_strided_slice %290 {offsets = [2, 0], sizes = [1, 8], strides = [1, 1]} : vector<4x8xf32> to vector<1x8xf32>
    %323 = vector.broadcast %321 : vector<8x1xf32> to vector<8x8xf32>
    %324 = vector.broadcast %322 : vector<1x8xf32> to vector<8x8xf32>
    %325 = arith.subf %323, %324 : vector<8x8xf32>
    %cst_111 = arith.constant 0.000000e+00 : f32
    %326 = vector.broadcast %cst_111 : f32 to vector<8x8xf32>
    %327 = arith.select %7, %325, %326 : vector<8x8xi1>, vector<8x8xf32>
    %328 = math.exp %327 : vector<8x8xf32>
    %329 = arith.mulf %328, %9 : vector<8x8xf32>
    %330 = arith.mulf %329, %286 : vector<8x8xf32>
    %331 = vector.extract_strided_slice %234 {offsets = [0, 32], sizes = [8, 16], strides = [1, 1]} : vector<8x64xf32> to vector<8x16xf32>
    %332 = vector.extract_strided_slice %278 {offsets = [0, 2], sizes = [8, 1], strides = [1, 1]} : vector<8x4xf32> to vector<8x1xf32>
    %333 = vector.broadcast %332 : vector<8x1xf32> to vector<8x16xf32>
    %334 = arith.mulf %331, %333 : vector<8x16xf32>
    %cst_112 = arith.constant dense<0.000000e+00> : vector<8x16xf32>
    %335 = tpu.matmul %330, %334, %cst_112 {dimension_numbers = #tpu.dot_dimension_numbers<[1], [0], [0], [1], [0, 0, 1, 1], [], []>} : vector<8x8xf32>, vector<8x16xf32>, vector<8x16xf32> -> vector<8x16xf32>
    %336 = vector.extract_strided_slice %289 {offsets = [0, 3], sizes = [8, 1], strides = [1, 1]} : vector<8x4xf32> to vector<8x1xf32>
    %337 = vector.extract_strided_slice %290 {offsets = [3, 0], sizes = [1, 8], strides = [1, 1]} : vector<4x8xf32> to vector<1x8xf32>
    %338 = vector.broadcast %336 : vector<8x1xf32> to vector<8x8xf32>
    %339 = vector.broadcast %337 : vector<1x8xf32> to vector<8x8xf32>
    %340 = arith.subf %338, %339 : vector<8x8xf32>
    %cst_113 = arith.constant 0.000000e+00 : f32
    %341 = vector.broadcast %cst_113 : f32 to vector<8x8xf32>
    %342 = arith.select %7, %340, %341 : vector<8x8xi1>, vector<8x8xf32>
    %343 = math.exp %342 : vector<8x8xf32>
    %344 = arith.mulf %343, %9 : vector<8x8xf32>
    %345 = arith.mulf %344, %286 : vector<8x8xf32>
    %346 = vector.extract_strided_slice %234 {offsets = [0, 48], sizes = [8, 16], strides = [1, 1]} : vector<8x64xf32> to vector<8x16xf32>
    %347 = vector.extract_strided_slice %278 {offsets = [0, 3], sizes = [8, 1], strides = [1, 1]} : vector<8x4xf32> to vector<8x1xf32>
    %348 = vector.broadcast %347 : vector<8x1xf32> to vector<8x16xf32>
    %349 = arith.mulf %346, %348 : vector<8x16xf32>
    %cst_114 = arith.constant dense<0.000000e+00> : vector<8x16xf32>
    %350 = tpu.matmul %345, %349, %cst_114 {dimension_numbers = #tpu.dot_dimension_numbers<[1], [0], [0], [1], [0, 0, 1, 1], [], []>} : vector<8x8xf32>, vector<8x16xf32>, vector<8x16xf32> -> vector<8x16xf32>
    %351 = tpu.concatenate %305, %320, %335, %350 in 1 : vector<8x16xf32>, vector<8x16xf32>, vector<8x16xf32>, vector<8x16xf32> -> vector<8x64xf32>
    %352 = vector.broadcast %281 : vector<1x64xf32> to vector<8x64xf32>
    %353 = arith.mulf %352, %234 : vector<8x64xf32>
    %354 = arith.addf %351, %353 : vector<8x64xf32>
    %cst_115 = arith.constant 0.000000e+00 : f32
    %355 = vector.broadcast %cst_115 : f32 to vector<8x64xf32>
    %356 = arith.subf %355, %197 : vector<8x64xf32>
    %357 = math.exp %356 : vector<8x64xf32>
    %cst_116 = arith.constant 1.000000e+00 : f32
    %358 = vector.broadcast %cst_116 : f32 to vector<8x64xf32>
    %359 = arith.addf %358, %357 : vector<8x64xf32>
    %360 = arith.divf %197, %359 : vector<8x64xf32>
    %361 = arith.mulf %354, %360 : vector<8x64xf32>
    %362 = arith.mulf %361, %361 : vector<8x64xf32>
    %cst_117 = arith.constant dense<0.000000e+00> : vector<8xf32>
    %363 = vector.multi_reduction <add>, %362, %cst_117 [1] : vector<8x64xf32> to vector<8xf32>
    %364 = vector.shape_cast %363 : vector<8xf32> to vector<8x1xf32>
    %cst_118 = arith.constant 6.400000e+01 : f32
    %365 = vector.broadcast %cst_118 : f32 to vector<8x1xf32>
    %366 = arith.divf %364, %365 : vector<8x1xf32>
    %cst_119 = arith.constant 9.99999974E-6 : f32
    %367 = vector.broadcast %cst_119 : f32 to vector<8x1xf32>
    %368 = arith.addf %366, %367 : vector<8x1xf32>
    %369 = math.rsqrt %368 : vector<8x1xf32>
    %370 = vector.broadcast %369 : vector<8x1xf32> to vector<8x64xf32>
    %371 = arith.mulf %361, %370 : vector<8x64xf32>
    %372 = vector.broadcast %283 : vector<1x64xf32> to vector<8x64xf32>
    %373 = arith.mulf %371, %372 : vector<8x64xf32>
    %374 = arith.truncf %373 : vector<8x64xf32> to vector<8x64xbf16>
    %c1_120 = arith.constant 1 : index
    %c0_121 = arith.constant 0 : index
    %c0_122 = arith.constant 0 : index
    %375 = vector.load %arg12[%c1_120, %c0_121, %c0_122] : memref<2x64x32xbf16, #tpu.memory_space<vmem>>, vector<1x64x32xbf16>
    %376 = vector.shape_cast %375 : vector<1x64x32xbf16> to vector<64x32xbf16>
    %cst_123 = arith.constant dense<0.000000e+00> : vector<8x32xf32>
    %377 = tpu.matmul %374, %376, %cst_123 {dimension_numbers = #tpu.dot_dimension_numbers<[1], [0], [0], [1], [0, 0, 1, 1], [], []>} : vector<8x64xbf16>, vector<64x32xbf16>, vector<8x32xf32> -> vector<8x32xf32>
    %378 = vector.shape_cast %377 : vector<8x32xf32> to vector<1x8x32xf32>
    %c0_124 = arith.constant 0 : index
    %c0_125 = arith.constant 0 : index
    %c0_126 = arith.constant 0 : index
    %379 = vector.load %arg13[%c0_124, %c0_125, %c0_126] : memref<1x8x32xf32, #tpu.memory_space<vmem>>, vector<1x8x32xf32>
    tpu.vector_store %arg13[%c0_124, %c0_125, %c0_126], %378 {strides = array<i32>} : memref<1x8x32xf32, #tpu.memory_space<vmem>>, vector<1x8x32xf32>,
    return
  }
  func.func @transform_0(%arg0: i32) -> (i32, i32, i32) {
    %c0_i32 = arith.constant 0 : i32
    %c0_i32_0 = arith.constant 0 : i32
    %c0_i32_1 = arith.constant 0 : i32
    return %arg0, %c0_i32, %c0_i32_0 : i32, i32, i32
  }
  func.func @transform_1(%arg0: i32) -> (i32, i32) {
    %c0_i32 = arith.constant 0 : i32
    %c0_i32_0 = arith.constant 0 : i32
    %c0_i32_1 = arith.constant 0 : i32
    return %c0_i32, %c0_i32_0 : i32, i32
  }
  func.func @transform_2(%arg0: i32) -> (i32, i32, i32) {
    %c0_i32 = arith.constant 0 : i32
    %c0_i32_0 = arith.constant 0 : i32
    %c0_i32_1 = arith.constant 0 : i32
    %c0_i32_2 = arith.constant 0 : i32
    return %c0_i32, %c0_i32_0, %c0_i32_1 : i32, i32, i32
  }
  func.func @transform_3(%arg0: i32) -> (i32, i32, i32) {
    %c0_i32 = arith.constant 0 : i32
    %c0_i32_0 = arith.constant 0 : i32
    %c0_i32_1 = arith.constant 0 : i32
    %c0_i32_2 = arith.constant 0 : i32
    return %c0_i32, %c0_i32_0, %c0_i32_1 : i32, i32, i32
  }
  func.func @transform_4(%arg0: i32) -> (i32, i32, i32) {
    %c0_i32 = arith.constant 0 : i32
    %c0_i32_0 = arith.constant 0 : i32
    %c0_i32_1 = arith.constant 0 : i32
    %c0_i32_2 = arith.constant 0 : i32
    return %c0_i32, %c0_i32_0, %c0_i32_1 : i32, i32, i32
  }
  func.func @transform_5(%arg0: i32) -> (i32, i32, i32) {
    %c0_i32 = arith.constant 0 : i32
    %c0_i32_0 = arith.constant 0 : i32
    %c0_i32_1 = arith.constant 0 : i32
    %c0_i32_2 = arith.constant 0 : i32
    return %c0_i32, %c0_i32_0, %c0_i32_1 : i32, i32, i32
  }
  func.func @transform_6(%arg0: i32) -> (i32, i32, i32) {
    %c0_i32 = arith.constant 0 : i32
    %c0_i32_0 = arith.constant 0 : i32
    %c0_i32_1 = arith.constant 0 : i32
    %c0_i32_2 = arith.constant 0 : i32
    return %c0_i32, %c0_i32_0, %c0_i32_1 : i32, i32, i32
  }
  func.func @transform_7(%arg0: i32) -> (i32, i32, i32) {
    %c0_i32 = arith.constant 0 : i32
    %c0_i32_0 = arith.constant 0 : i32
    %c0_i32_1 = arith.constant 0 : i32
    %c0_i32_2 = arith.constant 0 : i32
    return %c0_i32, %c0_i32_0, %c0_i32_1 : i32, i32, i32
  }
  func.func @transform_8(%arg0: i32) -> (i32, i32, i32) {
    %c0_i32 = arith.constant 0 : i32
    %c0_i32_0 = arith.constant 0 : i32
    %c0_i32_1 = arith.constant 0 : i32
    %c0_i32_2 = arith.constant 0 : i32
    return %c0_i32, %c0_i32_0, %c0_i32_1 : i32, i32, i32
  }
  func.func @transform_9(%arg0: i32) -> (i32, i32, i32) {
    %c0_i32 = arith.constant 0 : i32
    %c0_i32_0 = arith.constant 0 : i32
    %c0_i32_1 = arith.constant 0 : i32
    %c0_i32_2 = arith.constant 0 : i32
    return %c0_i32, %c0_i32_0, %c0_i32_1 : i32, i32, i32
  }
  func.func @transform_10(%arg0: i32) -> (i32, i32, i32) {
    %c0_i32 = arith.constant 0 : i32
    %c0_i32_0 = arith.constant 0 : i32
    %c0_i32_1 = arith.constant 0 : i32
    %c0_i32_2 = arith.constant 0 : i32
    return %c0_i32, %c0_i32_0, %c0_i32_1 : i32, i32, i32
  }
  func.func @transform_11(%arg0: i32) -> (i32, i32, i32) {
    %c0_i32 = arith.constant 0 : i32
    %c0_i32_0 = arith.constant 0 : i32
    %c0_i32_1 = arith.constant 0 : i32
    %c0_i32_2 = arith.constant 0 : i32
    return %c0_i32, %c0_i32_0, %c0_i32_1 : i32, i32, i32
  }
  func.func @transform_12(%arg0: i32) -> (i32, i32, i32) {
    %c0_i32 = arith.constant 0 : i32
    %c0_i32_0 = arith.constant 0 : i32
    %c0_i32_1 = arith.constant 0 : i32
    return %arg0, %c0_i32, %c0_i32_0 : i32, i32, i32
  }
}

</mosaic_0001>

<bundles_post_ra>
// kernel: tpu_custom_call.1
= control target key start
LH: loop header
LB: loop body
LE: loop exit
PB: predicated region body
PF: predicated region fallthrough
CT: control target
= control target key end

     0   :  { %s4001_s0 = inlined_call_operand.vmem [shape: f32[2,8,32], index: 0, kind: input, shape index: {}]   ;;  %s4002_s1 = inlined_call_operand.vmem [shape: f32[8,32], index: 1, kind: input, shape index: {}]   ;;  %s4003_s2 = inlined_call_operand.vmem [shape: bf16[2,32,64], index: 2, kind: input, shape index: {}]   ;;  %s4004_s3 = inlined_call_operand.hbm [shape: bf16[2,32,64], index: 3, kind: input, shape index: {}]   ;;  %s4005_s4 = inlined_call_operand.vmem [shape: bf16[2,32,256], index: 4, kind: input, shape index: {}]   ;;  %s4006_s5 = inlined_call_operand.vmem [shape: bf16[2,32,4], index: 5, kind: input, shape index: {}]   ;;  %s4007_s6 = inlined_call_operand.hbm [shape: f32[2,4,64], index: 6, kind: input, shape index: {}]   ;;  %s4008_s7 = inlined_call_operand.hbm [shape: f32[2,4,256], index: 7, kind: input, shape index: {}]   ;;  %s4009_s8 = inlined_call_operand.vmem [shape: f32[2,2,4], index: 8, kind: input, shape index: {}]   ;;  %s4010_s9 = inlined_call_operand.vmem [shape: f32[2,1,64], index: 9, kind: input, shape index: {}]   ;;  %s4011_s10 = inlined_call_operand.vmem [shape: f32[2,1,64], index: 10, kind: input, shape index: {}]   ;;  %s4012_s11 = inlined_call_operand.vmem [shape: bf16[2,64,32], index: 11, kind: input, shape index: {}]   ;;  %s4013_s12 = inlined_call_operand.hbm [shape: f32[2,8,32], index: 12, kind: output, shape index: {}]  }
   0x1   :  { %4026 = sst [smem:[#allocation19_spill]] %s4013_s12 }
   0x2   :  { %17 = vsyncpa [#allocation3], 0 }
   0x3   :  { %18 = vsyncpa [#allocation6], 0 }
   0x4   :  { %19 = vsyncpa [#allocation4], 0 }
   0x5   :  { %21 = vsyncpa [#allocation4 + $0x1], 0  ;;  %s3407_s21 = smov 0   ;;  %s3409_s22 = smov 0  }
   0x6   :  { %s3411_s23 = smov 0   ;;  %s3413_s24 = smov 0  }
   0x7 LB: > { %4027 = sst [smem:[#allocation12_spill]] %s3308_s21  ;;  %s3428_s25 = sadd.s32 4294967295, %s3320_s24   ;;  %s3320_s24 = sphi %s3413_s24, %s4053_s24   ;;  %s3316_s23 = sphi %s3411_s23, %s4055_s23   ;;  %s3312_s22 = sphi %s3409_s22, %s4057_s22   ;;  %s3308_s21 = sphi %s3407_s21, %s4056_s21  }
   0x8   : > { %4028 = sst [smem:[#allocation13_spill]] %s3316_s23  ;;  %s2694_s26 = sadd.s32 4294967294, %s3320_s24  }
   0x9   : > { %4029 = sst [smem:[#allocation14_spill]] %s3320_s24  ;;  %s3432_s27 = sadd.s32 1, %s3320_s24  }
   0xa   : > { %4030 = sst [smem:[#allocation15_spill]] %s3432_s27  ;;  %s291_s28 = sadd.s32 1, %s3316_s23 }
   0xb   : > { %s288_s29 = ssub.s32 %s3320_s24, %s3432_s27  ;;  %p301_p0 = scmp.ne.s32.totalorder %s3316_s23, %s3312_s22 }
   0xc   : > { %p289_p1 = scmp.eq.s32.totalorder %s288_s29, 0  ;;  %p302_p2 = scmp.eq.s32.totalorder %s3428_s25, 1 }
   0xd   : > { %p307_p3 = scmp.ne.s32.totalorder %s3312_s22, %s3308_s21  ;;  %p308_p4 = scmp.eq.s32.totalorder %s2694_s26, 1 }
   0xe   : > { %s3443_s30 = scalar_select %p289_p1, %s3316_s23, %s291_s28  }
   0xf   : > { %p3445_p5 = por %p302_p2, %p301_p0  ;;  %p3449_p6 = por %p308_p4, %p307_p3 }
  0x10   : > { %4031 = sst [smem:[#allocation16_spill]] %s3443_s30  ;;  %p2695_p7 = scmp.ge.s32.totalorder %s3320_s24, 1 }
  0x11   : > { %s4032_s13 = scalar_select %p3445_p5, 1, 0 }
  0x12   : > { %s4034_s14 = scalar_select %p3449_p6, 1, 0 }
  0x13   : > { %4033 = sst [smem:[#allocation17_spill]] %s4032_s13  ;;  %p315_p8 = scmp.lt.s32.totalorder %s3320_s24, 3 }
  0x14   : > { %4035 = sst [smem:[#allocation18_spill]] %s4034_s14  ;;  %p4018_p9 = scmp.eq.s32.totalorder %s3428_s25, 0 }
  0x15   : > { %p3456_p10 = pnand %p2695_p7, %p315_p8  ;;  %s3322_s16 = smov [#allocation5]  }
  0x16   : > { %s352_s17 = sshll.u32 %s3322_s16, 4  ;;  %s3323_s19 = smov [#allocation2]   ;;  %s3462_s17 = int_to_ptr.vmem [resolvable:$true] %s352_s17 }
  0x17   : > { %s4036_s15 = scalar_select %p3456_p10, 1, 0 }
  0x18   : > { %p2986_p11 = pneg %p3456_p10  ;;  %s333_s20 = sshll.u32 %s3323_s19, 4  ;;  %s3470_s20 = int_to_ptr.vmem [resolvable:$true] %s333_s20 }
  0x19   : > { %s3324_s26 = smov [#allocation7]   ;;  %s3166_s23 = scalar_lea.hbm %s4007_s6, 128 }
  0x1a   : > { %p3466_p12 = pnand %p4018_p9, %p2986_p11  ;;  %s3472_s28 = sshll.u32 %s3324_s26, 4  ;;  %s366_s28 = int_to_ptr.vmem [resolvable:$true] %s3472_s28 }
  0x1b   : > { %p3167_p13 = scmp.ne.s32.totalorder %s4007_s6, %s3166_s23  ;;  %p3173_p3 = scmp.lt.u32.totalorder %s3166_s23, %s4007_s6 }
  0x1c   : > { %p3482_p0 = pneg %p3466_p12 }
  0x1e   : > { %p3169_p1 = pnand %p3482_p0, %p3167_p13 }
  0x20   : > { %p3170_p2 = pneg %p3169_p1 }
  0x22   : > { %p3175_p4 = pnand %p3173_p3, %p3170_p2 }
  0x24   : > { %3178 = shalt.err (!%p3175_p4)
}
  0x25   : > { %s3179_s27 = scalar_lea.vmem %s3462_s17, 128  ;;  %p3187_p9 = scmp.lt.s32.totalorder %s3462_s17, %s3462_s17 }
  0x26   : > { %p3180_p7 = scmp.ne.s32.totalorder %s3462_s17, %s3179_s27  ;;  %p3188_p6 = scmp.lt.s32.totalorder %s3179_s27, %s3179_s27 }
  0x28   : > { %p3182_p8 = pnand %p3180_p7, %p3482_p0  ;;  %p3189_p13 = por %p3188_p6, %p3187_p9 }
  0x2a   : > { %p3183_p11 = pneg %p3182_p8 }
  0x2c   : > { %p3190_p1 = pnand %p3189_p13, %p3183_p11 }
  0x2e   : > { %3193 = shalt.err (!%p3190_p1)
}
  0x2f   : > { %s3325_s30 = smov 64   ;;  %s3326_s23 = smov 4  }
  0x30   : > { %2992 = dma.hbm_to_vmem [thread:$0]  (!%p3466_p12), %s4007_s6, 128, %s3462_s17, [#allocation6], %s3325_s30, %s3325_s30, %s3326_s23  }
  0x31   : > { %s3194_s21 = scalar_lea.hbm %s4004_s3, 512 }
  0x32   : > { %p3195_p6 = scmp.ne.s32.totalorder %s4004_s3, %s3194_s21  ;;  %p3201_p3 = scmp.lt.u32.totalorder %s3194_s21, %s4004_s3 }
  0x34   : > { %p3197_p9 = pnand %p3195_p6, %p3482_p0 }
  0x36   : > { %p3198_p2 = pneg %p3197_p9 }
  0x38   : > { %p3203_p4 = pnand %p3201_p3, %p3198_p2 }
  0x3a   : > { %3206 = shalt.err (!%p3203_p4)
}
  0x3b   : > { %s3207_s17 = scalar_lea.vmem %s3470_s20, 512  ;;  %p3215_p13 = scmp.lt.s32.totalorder %s3470_s20, %s3470_s20 }
  0x3c   : > { %p3208_p7 = scmp.ne.s32.totalorder %s3470_s20, %s3207_s17  ;;  %p3216_p1 = scmp.lt.s32.totalorder %s3207_s17, %s3207_s17 }
  0x3e   : > { %p3210_p8 = pnand %p3208_p7, %p3482_p0  ;;  %p3217_p6 = por %p3216_p1, %p3215_p13 }
  0x40   : > { %p3211_p11 = pneg %p3210_p8 }
  0x42   : > { %p3218_p9 = pnand %p3217_p6, %p3211_p11 }
  0x44   : > { %3221 = shalt.err (!%p3218_p9)
}
  0x45   : > { %2989 = dma.hbm_to_vmem [thread:$0]  (!%p3466_p12), %s4004_s3, 512, %s3470_s20, [#allocation3], %s3325_s30, %s3325_s30, %s3326_s23  }
  0x46   : > { %s3222_s29 = scalar_lea.hbm %s4008_s7, 256 }
  0x47   : > { %p3223_p2 = scmp.ne.s32.totalorder %s4008_s7, %s3222_s29  ;;  %p3229_p7 = scmp.lt.u32.totalorder %s3222_s29, %s4008_s7 }
  0x49   : > { %p3225_p3 = pnand %p3223_p2, %p3482_p0 }
  0x4b   : > { %p3226_p4 = pneg %p3225_p3 }
  0x4d   : > { %p3231_p8 = pnand %p3229_p7, %p3226_p4 }
  0x4f   : > { %3234 = shalt.err (!%p3231_p8)
}
  0x50   : > { %s3235_s17 = scalar_lea.vmem %s366_s28, 256  ;;  %p3243_p6 = scmp.lt.s32.totalorder %s366_s28, %s366_s28 }
  0x51   : > { %p3236_p11 = scmp.ne.s32.totalorder %s366_s28, %s3235_s17  ;;  %p3244_p9 = scmp.lt.s32.totalorder %s3235_s17, %s3235_s17 }
  0x53   : > { %p3238_p13 = pnand %p3236_p11, %p3482_p0  ;;  %p3245_p5 = por %p3244_p9, %p3243_p6 }
  0x55   : > { %p3239_p1 = pneg %p3238_p13 }
  0x57   : > { %p3246_p10 = pnand %p3245_p5, %p3239_p1 }
  0x59   : > { %3249 = shalt.err (!%p3246_p10)
}
  0x5a   : > { %s3327_s20 = smov 128   ;;  %s3328_s30 = smov 8  }
  0x5b   : > { %2995 = dma.hbm_to_vmem [thread:$0]  (!%p3466_p12), %s4008_s7, 256, %s366_s28, [#allocation6], %s3327_s20, %s3327_s20, %s3328_s30  }
  0x5c   : > { %p4039_p2 = scmp.ne.s32.totalorder %s4036_s15, 0 }
  0x5d   : > { %p4040_p3 = scmp.eq.s32.totalorder (!%p4039_p2), %s3428_s25, 0 }
  0x5e   : > { %400 = sbr.rel (%p4039_p2) target bundleno = 2883 (0xb43), region = 68 }
  0x65   : > { %3295 = dma.done.wait (%p4040_p3), [#allocation3], 512   ;;  %p4041_p0 = pmov %p4040_p3 }
  0x67   : > { %3297 = vsyncadd (%p4041_p0), [#allocation3], 4294966784  ;;  %p4042_p5 = pmov %p4041_p0 }
  0x68   : > { %p4043_p10 = pmov %p4041_p0 }
  0x69   : > { %3299 = dma.done.wait (%p4042_p5), [#allocation6], 384  }
  0x6a   : > { %3301 = vsyncadd (%p4043_p10), [#allocation6], 4294966912  ;;  %p449_p4 = scmp.lt.s32.totalorder %s3428_s25, 1  ;;  %v3329_v0 = vmov 0.0   ;;  %vm3330_vm0 = vmmov 0   ;;  %v3331_v1 = vmov 0   ;;  %v457_v18 = vlaneseq }
  0x6b   : > { %2838 = vmatprep.subr.bf16.mxu1 %v3329_v0  ;;  %2842 = vmatprep.mubr.msk.bf16.mxu1 %vm3330_vm0, %v3329_v0  ;;  %v3074_v2 = vld [vmem:[%s4003_s2] sm:$0xff]   ;;  %v3075_v3 = vld [vmem:[%s4003_s2 + $0x8] sm:$0xff]   ;;  %vm481_vm1 = vcmask 261120   ;;  %v3083_v12 = vld [vmem:[%s4005_s4 + $0x14] ss:$8 sps:$4 sm:$0xff]   ;;  %v3332_v16 = vmov 3  }
  0x6c   : > { %s450_s14 = scalar_select %p449_p4, %s3428_s25, 1  ;;  %637 = vmatprep.mubr.bf16.mxu0 %v3331_v1  ;;  %2839 = vmatpush3.bf16.msra.mxu1 %v3074_v2  ;;  %v455_v5 = vld [vmem:[%s4002_s1] sm:$0xff]  ;;  %v3077_v11 = vld [vmem:[#allocation2 + $0x8] sm:$0xff]   ;;  %v3085_v13 = vld [vmem:[%s4005_s4 + $0x10] ss:$8 sps:$4 sm:$0xff]   ;;  %v3333_v17 = vmov 1  }
  0x6d   : > { %2840 = vmatprep.subr.bf16.mxu1 %v3329_v0  ;;  %v3076_v8 = vld [vmem:[#allocation2] sm:$0xff]   ;;  %v3079_v15 = vld [vmem:[%s4006_s5 + $0x8] sm:$0xff]   ;;  %3060 = vset.pattern.permute.xlu1 %v3332_v16  ;;  %v3613_v19 = vshrl.u32 %v457_v18, 7  ;;  %vm659_vm2 = vcmask 1040384   ;;  %vm669_vm3 = vcmask 1041408   ;;  %vm914_vm6 = vcmask 64512  }
  0x6e   : > { %s2705_s15 = sshll.u32 %s450_s14, 3  ;;  %v3080_v9 = vld [vmem:[%s4005_s4 + $0x4] ss:$8 sps:$4 sm:$0xff]   ;;  %v3082_v10 = vld [vmem:[%s4005_s4] ss:$8 sps:$4 sm:$0xff]   ;;  %3058 = vset.pattern.permute.xlu0 %v3333_v17  ;;  %s3335_s16 = smov 96  }
  0x6f   : > { %s452_s21 = scalar_lea.vmem %s4001_s0, %s2705_s15  ;;  %605 = vmatprep.subr.bf16.mxu0 %v3080_v9  ;;  %v3078_v14 = vld [vmem:[%s4006_s5] sm:$0xff]   ;;  %v688_v22 = vld [vmem:[#allocation7] sm:$0xff]  ;;  %v3618_v24 = vsub.s32 2, %v3613_v19  ;;  %v696_v25 = vsub.s32 6, %v3613_v19  ;;  %v3622_v27 = vsub.s32 1, %v3613_v19  ;;  %v724_v29 = vsub.s32 5, %v3613_v19 }
  0x70   : > { %v454_v4 = vld [vmem:[%s452_s21] sm:$0xff]  ;;  %2841 = vmatpush3.bf16.msra.mxu1 %v3075_v3  ;;  %606 = vmatpush1.bf16.msra.mxu0 %v3082_v10  ;;  %v3627_v30 = vsub.s32 0, %v3613_v19  ;;  %v752_v31 = vsub.s32 4, %v3613_v19  ;;  %v3647_v41 = vsub.s32 3, %v3613_v19  ;;  %v774_v46 = vsub.s32 7, %v3613_v19  ;;  %s3336_s19 = smov 112  }
  0x71   : > { %v456_v6 = vadd.f32 %v455_v5, %v454_v4  ;;  %2846 = vmatprep.subr.bf16.mxu1 %v3329_v0  ;;  %607 = vmatprep.subr.bf16.mxu0 %v3083_v12  ;;  %v693_v28 = vrot.slane %v688_v22, %v3618_v24  ;;  %v721_v32 = vrot.slane %v688_v22, %v3622_v27  ;;  %v3639_v36 = vld [vmem:[%s4009_s8] sm:$0x3]  ;;  %s3337_s26 = smov 80   ;;  %s3338_s27 = smov 16   ;;  %vm1414_vm7 = vcmask 130048  }
  0x72   : > { %v697_v33 = vrot.slane %v688_v22, %v696_v25  ;;  %v749_v34 = vrot.slane %v688_v22, %v3627_v30  ;;  %v725_v38 = vrot.slane %v688_v22, %v724_v29  ;;  %v753_v40 = vrot.slane %v688_v22, %v752_v31  ;;  %s3339_s17 = smov 32   ;;  %s3340_s20 = smov 48  }
  0x73   : > { %v464_v7 = vpack.c.bf16 %v456_v6, %v456_v6  ;;  %v703_v37 = vrot.slane %v693_v28, %v3618_v24  ;;  %v731_v44 = vrot.slane %v721_v32, %v3622_v27  ;;  %v804_v48 = vrot.slane %v3639_v36, %v3627_v30  ;;  %s4046_s14 = sld [smem:[#allocation17_spill]]  ;;  %s446_s15 = sand.u32 1, %s3312_s22  }
  0x74   : > { %608 = vmatpush1.bf16.msra.mxu0 %v3085_v13  ;;  %v707_v45 = vrot.slane %v697_v33, %v3618_v24  ;;  %v759_v50 = vrot.slane %v749_v34, %v3627_v30  ;;  %v771_v54 = vrot.slane %v688_v22, %v3647_v41  ;;  %v735_v55 = vrot.slane %v725_v38, %v3622_v27  ;;  %s2704_s18 = sshll.u32 %s446_s15, 3  ;;  %s2783_s28 = sshll.u32 %s3428_s25, 7 }
  0x75   : > { %2843 = vmatmul.mubr.msk.bf16.vlgmr.msra.gmra.mrb[0].mxu1 %vm481_vm1, %v464_v7  ;;  %2862 = vmatprep.subr.bf16.mxu0 %v3329_v0  ;;  %v763_v60 = vrot.slane %v753_v40, %v3627_v30  ;;  %v775_v3 = vrot.slane %v688_v22, %v774_v46  ;;  %vm1417_vm8 = vcmask 392192   ;;  %vm1435_vm9 = vcmask 523264   ;;  %s448_s21 = scalar_lea.vmem [#allocation8], %s2704_s18  ;;  %s3341_s25 = smov [#allocation8]  }
  0x76   : > { %2847 = vmatpush3.bf16.msra.mxu1 %v3076_v8  ;;  %2850 = vmatprep.mubr.msk.bf16.mxu1 %vm3330_vm0, %v3329_v0  ;;  %v781_v9 = vrot.slane %v771_v54, %v3647_v41  ;;  %s3254_s13 = sshll.u32 %s3341_s25, 4  ;;  %s3255_s13 = int_to_ptr.vmem [resolvable:$false] %s3254_s13 }
  0x77   : > { %2848 = vmatprep.subr.bf16.mxu1 %v3329_v0  ;;  %2717 = vmatmul.mubr.msk.bf16.vlgmr.msra.gmra.mrb[0].mxu0 %vm481_vm1, %v464_v7  ;;  %s3256_s29 = scalar_lea.vmem %s3255_s13, 256 }
  0x78   : > { %2864 = vmatprep.mubr.msk.bf16.mxu0 %vm3330_vm0, %v3329_v0 }
  0x79   : > { %p4048_p7 = scmp.ne.s32.totalorder %s4046_s14, 0 }
  0x7a   : > { %2849 = vmatpush3.bf16.msra.mxu1 %v3077_v11 }
  0x7b   : > { %2854 = vmatprep.subr.bf16.mxu1 %v3329_v0 }
  0x7d   : > { %2851 = vmatmul.mubr.msk.bf16.vlgmr.msra.gmra.mrb[4].mxu1 %vm481_vm1, %v464_v7 }
  0x7e   : > { %2855 = vmatpush3.bf16.msra.mxu1 %v3078_v14  ;;  %2858 = vmatprep.mubr.msk.bf16.mxu1 %vm3330_vm0, %v3329_v0 }
  0x7f   : > { %2856 = vmatprep.subr.bf16.mxu1 %v3329_v0 }
  0x82   : > { %2857 = vmatpush3.bf16.msra.mxu1 %v3079_v15 }
  0x83   : > { %2868 = vmatprep.subr.mxu1 %v3329_v0 }
  0x85   : > { %2859 = vmatmul.mubr.msk.bf16.vlgmr.msra.gmra.mrb[8].mxu1 %vm481_vm1, %v464_v7 }
  0x86   : > { %2870 = vmatprep.mubr.msk.f32.mxu1 %vm3330_vm0, %v3329_v0 }
 0x148   : > { %v3615_v20 = vpop.f32.mrb[0].mxu1 }
 0x149   : > { %v2844_v21 = vpop.f32.mrb[1].mxu1 }
 0x14a   : > { %v522_v23 = vpop.f32.mrb[2].mxu1  ;;  %v639_v43 = vpop.f32.mrb[0].mxu0 }
 0x14b   : > { %v2845_v26 = vpop.f32.mrb[3].mxu1  ;;  %v712_v49 = vrot.slane %v639_v43, 7  ;;  %v641_v51 = vpop.f32.mrb[1].mxu0  ;;  %v708_v52 = vmul.f32 %v703_v37, %v639_v43  ;;  %v740_v53 = vrot.slane %v639_v43, 6  ;;  %v785_v23 = vrot.slane %v775_v3, %v3647_v41 }
 0x14c   : > { %v643_v56 = vpop.f32.mrb[2].mxu0  ;;  %v713_v58 = vrot.slane %v641_v51, 7  ;;  %v741_v59 = vrot.slane %v641_v51, 6  ;;  %v709_v2 = vmul.f32 %v707_v45, %v641_v51  ;;  %v912_v51 = vrot.slane %v3639_v36, %v3622_v27 }
 0x14d   : > { %v716_v57 = vsel %vm659_vm2, 0.0, %v712_v49  ;;  %v644_v61 = vpop.f32.mrb[3].mxu0  ;;  %v744_v63 = vsel %vm669_vm3, 0.0, %v740_v53  ;;  %v460_v49 = vand.u32 127, %v457_v18  ;;  %v3334_v36 = vmov 2  }
 0x14e   : > { %v736_v62 = vmul.f32 %v731_v44, %v716_v57  ;;  %v764_v4 = vmul.f32 %v759_v50, %v744_v63  ;;  %v717_v5 = vsel %vm659_vm2, 0.0, %v713_v58  ;;  %v745_v6 = vsel %vm669_vm3, 0.0, %v741_v59  ;;  %v650_v63 = vld [vmem:[#allocation5] sm:$0xf] }
 0x14f   : > { %v737_v10 = vmul.f32 %v735_v55, %v717_v5  ;;  %v765_v13 = vmul.f32 %v763_v60, %v745_v6  ;;  %vm3670_vm4 = vcmp.ge.s32.totalorder %v3613_v19, %v460_v49 }
 0x150   : > { %v3634_v35 = vpop.f32.mrb[4].mxu1  ;;  %v738_v8 = vadd.f32 %v736_v62, %v708_v52  ;;  %v3677_v18 = vsel %vm3670_vm4, 1.0, %v3329_v0 }
 0x151   : > { %v2852_v39 = vpop.f32.mrb[5].mxu1  ;;  %v739_v21 = vadd.f32 %v737_v10, %v709_v2  ;;  %v657_v62 = vrot.slane %v3634_v35, 7  ;;  %v664_v2 = vrot.slane %v650_v63, %v3622_v27  ;;  %v667_v5 = vrot.slane %v3634_v35, 6 }
 0x152   : > { %v578_v42 = vpop.f32.mrb[6].mxu1  ;;  %v766_v15 = vadd.f32 %v764_v4, %v738_v8  ;;  %v654_v4 = vrot.slane %v650_v63, %v3618_v24  ;;  %v674_v8 = vrot.slane %v650_v63, %v3627_v30 }
 0x153   : > { %v2853_v47 = vpop.f32.mrb[7].mxu1  ;;  %v767_v32 = vadd.f32 %v765_v13, %v739_v21  ;;  %v660_v3 = vsel %vm659_vm2, 0.0, %v657_v62  ;;  %v680_v13 = vrot.slane %v650_v63, %v3647_v41 }
 0x154   : > { %v786_v28 = vadd.f32 %v781_v9, %v766_v15  ;;  %v665_v6 = vmul.f32 %v664_v2, %v660_v3  ;;  %v670_v9 = vsel %vm669_vm3, 0.0, %v667_v5 }
 0x155   : > { %v787_v37 = vadd.f32 %v785_v23, %v767_v32 }
 0x156   : > { %v788_v34 = vsub.f32 0.0, %v786_v28 }
 0x157   : > { %v789_v39 = vsub.f32 0.0, %v787_v37 }
 0x158   : > { %v851_v7 = vpop.f32.mrb[8].mxu1  ;;  %v790_v38 = vmul.f32 1.442695, %v788_v34 }
 0x159   : > { %v852_v11 = vadd.f32 %v851_v7, %v804_v48  ;;  %v2860_v12 = vpop.f32.mrb[9].mxu1  ;;  %v792_v40 = vmul.f32 1.442695, %v789_v39  ;;  %v655_v7 = vmul.f32 %v654_v4, %v3634_v35 }
 0x15a   : > { %v854_v14 = vpop.f32.mrb[10].mxu1 }
 0x15b   : > { %v858_v26 = vmin.f32 %v852_v11, 20.0  ;;  %v2861_v22 = vpop.f32.mrb[11].mxu1  ;;  %vm857_vm5 = vcmp.gt.f32.partialorder %v852_v11, 20.0  ;;  %v666_v10 = vadd.f32 %v665_v6, %v655_v7 }
 0x15d   : > { %v859_v33 = vmul.f32 1.442695, %v858_v26 }
 0x15f   : > { %3106 = vpow2.f32 %v859_v33 }
 0x160   : > { %3108 = vpow2.f32 %v790_v38 }
 0x161   : > { %3110 = vpow2.f32 %v792_v40 }
 0x169   : > { %v3107_v42 = vpop.eup %3106 }
 0x16a   : > { %v861_v43 = vadd.f32 1.0, %v3107_v42  ;;  %v3109_v44 = vpop.eup %3108 }
 0x16b   : > { %v3111_v45 = vpop.eup %3110  ;;  %v794_v47 = vadd.f32 1.0, %v3109_v44 }
 0x16c   : > { %3112 = vlog2.f32 %v861_v43  ;;  %v795_v48 = vadd.f32 1.0, %v3111_v45 }
 0x16d   : > { %3114 = vrcp.f32 %v794_v47 }
 0x16e   : > { %3116 = vrcp.f32 %v795_v48 }
 0x176   : > { %v3113_v50 = vpop.eup %3112 }
 0x177   : > { %v863_v52 = vmul.f32 0.6931472, %v3113_v50  ;;  %v3115_v56 = vpop.eup %3114 }
 0x178   : > { %v3117_v57 = vpop.eup %3116  ;;  %v797_v58 = vmul.f32 %v3115_v56, %v786_v28 }
 0x179   : > { %v864_v54 = vsel %vm857_vm5, %v852_v11, %v863_v52  ;;  %v799_v60 = vmul.f32 %v3117_v57, %v787_v37  ;;  %v675_v11 = vmul.f32 %v674_v8, %v670_v9 }
 0x17a   : > { %v913_v55 = vmul.f32 %v912_v51, %v864_v54  ;;  %1321 = vperm.xlu1 %3060, %v864_v54   ;;  %1129 = vperm.xlu0 %3058, %v864_v54   ;;  %v868_v59 = vpack.c.bf16 %v797_v58, %v797_v58 }
 0x17b   : > { %v867_v61 = vpack.c.bf16 %v799_v60, %v799_v60  ;;  %v676_v12 = vadd.f32 %v675_v11, %v666_v10 }
 0x17c   : > { %2869 = vmatpush3.msra.mxu1 %v913_v55  ;;  %2863 = vmatpush3.bf16.xpose.msra.mxu0 %v868_v59 }
 0x17d   : > { %2871 = vmatmul.mubr.msk.f32.vlgmr.msra.gmra.mrb[12].mxu1 %vm914_vm6, %v3677_v18  ;;  %2873 = vmatprep.subr.mxu1 %v3329_v0  ;;  %v681_v14 = vadd.f32 %v680_v13, %v676_v12 }
 0x17e   : > { %3059 = vset.pattern.permute.xlu0 %v3334_v36  ;;  %3061 = vset.pattern.permute.xlu1 %v3331_v1 }
 0x17f   : > { %1225 = vperm.xlu0 %3059, %v864_v54   ;;  %2875 = vmatprep.mubr.msk.f32.mxu1 %vm3330_vm0, %v3329_v0  ;;  %v682_v15 = vsub.f32 0.0, %v681_v14 }
 0x180   : > { %2878 = vmatprep.subr.mxu0 %v3329_v0 }
 0x181   : > { %v683_v21 = vmul.f32 1.442695, %v682_v15 }
 0x183   : > { %2865 = vmatmul.mubr.bf16.vlgmr.msra.gmra.mrb[4].mxu0 %v867_v61  ;;  %3118 = vpow2.f32 %v683_v21 }
 0x184   : > { %2880 = vmatprep.mubr.msk.f32.mxu0 %vm3330_vm0, %v3329_v0 }
 0x18d   : > { %v3119_v23 = vpop.eup %3118 }
 0x18e   : > { %v685_v26 = vadd.f32 1.0, %v3119_v23 }
 0x190   : > { %3120 = vrcp.f32 %v685_v26 }
 0x19a   : > { %v3121_v32 = vpop.eup %3120 }
 0x19b   : > { %v3700_v34 = vmul.f32 %v3121_v32, %v681_v14 }
 0x1f9   : > { %v1130_v22 = vpop.permute.xlu0 %1129  ;;  %v1322_v39 = vpop.permute.xlu1 %1321 }
 0x1fa   : > { %v1132_v37 = vmul.f32 %v1130_v22, %v3700_v34  ;;  %v1324_v40 = vmul.f32 %v1322_v39, %v3700_v34 }
 0x1fe   : > { %v1226_v33 = vpop.permute.xlu0 %1225 }
 0x1ff   : > { %v1228_v38 = vmul.f32 %v1226_v33, %v3700_v34 }
 0x250   : > { %v984_v28 = vpop.f32.mrb[12].mxu1 }
 0x251   : > { %1211 = vperm.xlu0 %3059, %v984_v28   ;;  %1022 = vperm.xlu1 %3061, %v984_v28   ;;  %v2872_v35 = vpop.f32.mrb[13].mxu1 }
 0x255   : > { %3063 = vset.pattern.permute.xlu0 %v3331_v1  ;;  %3062 = vset.pattern.permute.xlu1 %v3333_v17 }
 0x256   : > { %1037 = vperm.xlu0 %3063, %v864_v54   ;;  %1115 = vperm.xlu1 %3062, %v984_v28   ;;  %v903_v42 = vpop.f32.mrb[4].mxu0 }
 0x257   : > { %v2866_v43 = vpop.f32.mrb[5].mxu0 }
 0x258   : > { %v906_v44 = vpop.f32.mrb[6].mxu0 }
 0x259   : > { %v2867_v45 = vpop.f32.mrb[7].mxu0 }
 0x25a   : > { %1230 = vrot.lane.b32.xlu0 %v1228_v38, %s3335_s16  ;;  %1134 = vrot.lane.b32.xlu1 %v1132_v37, %s3336_s19 }
 0x25b   : > { %3064 = vset.pattern.permute.xlu1 %v3332_v16  ;;  %3066 = vset.pattern.permute.xlu0 %v3334_v36 }
 0x25e   : > { %1326 = vrot.lane.b32.xlu0 %v1324_v40, %s3337_s26  ;;  %1307 = vperm.xlu1 %3064, %v984_v28  }
 0x287   : > { %988 = vxpose.xlu1.b32.start.end [1/1] (short) (narrow) %v984_v28, 8 }
 0x2a5   : > { %3065 = vset.pattern.permute.xlu1 %v3333_v17 }
 0x2d0   : > { %v1212_v47 = vpop.permute.xlu0 %1211  ;;  %v1023_v48 = vpop.permute.xlu1 %1022 }
 0x2d5   : > { %v1038_v49 = vpop.permute.xlu0 %1037  ;;  %v1116_v50 = vpop.permute.xlu1 %1115 }
 0x2d6   : > { %v1040_v51 = vmul.f32 %v1038_v49, %v3700_v34 }
 0x2d8   : > { %2874 = vmatpush3.msra.mxu1 %v1040_v51 }
 0x2d9   : > { %v1135_v52 = vpop.permute.xlu1 %1134  ;;  %2883 = vmatprep.subr.mxu1 %v3329_v0  ;;  %v1231_v11 = vpop.permute.xlu0 %1230 }
 0x2da   : > { %2879 = vmatpush3.msra.mxu0 %v1135_v52 }
 0x2db   : > { %2888 = vmatprep.subr.mxu0 %v3329_v0 }
 0x2dd   : > { %v1308_v54 = vpop.permute.xlu1 %1307  ;;  %v1327_v35 = vpop.permute.xlu0 %1326 }
 0x307   : > { %v1004_v55 = vpop.trf.xlu1 }
 0x308   : > { %v1028_v56 = vrot.slane %v1004_v55, %v3627_v30  ;;  %v1121_v57 = vrot.slane %v1004_v55, %v3622_v27  ;;  %v1217_v58 = vrot.slane %v1004_v55, %v3618_v24  ;;  %v1313_v59 = vrot.slane %v1004_v55, %v3647_v41 }
 0x30a   : > { %v1029_v60 = vsub.f32 %v1023_v48, %v1028_v56  ;;  %v1122_v61 = vsub.f32 %v1116_v50, %v1121_v57  ;;  %v1218_v62 = vsub.f32 %v1212_v47, %v1217_v58  ;;  %v1314_v63 = vsub.f32 %v1308_v54, %v1313_v59  ;;  %v2726_v54 = vld [vmem:[%s4010_s9] ss:$0 sm:$0xff] }
 0x30b   : > { %v1427_v47 = vsub.f32 0.0, %v3615_v20  ;;  %v1425_v58 = vmul.f32 %v2726_v54, %v3700_v34  ;;  %v3087_v34 = vld [vmem:[%s4012_s11 + $0x8] sm:$0xff]  }
 0x30c   : > { %v1030_v2 = vsel %vm3670_vm4, %v1029_v60, 0.0  ;;  %v1123_v3 = vsel %vm3670_vm4, %v1122_v61, 0.0  ;;  %v1219_v4 = vsel %vm3670_vm4, %v1218_v62, 0.0  ;;  %v1315_v5 = vsel %vm3670_vm4, %v1314_v63, 0.0 }
 0x30d   : > { %v1031_v6 = vmul.f32 1.442695, %v1030_v2  ;;  %v1124_v7 = vmul.f32 1.442695, %v1123_v3  ;;  %v1220_v8 = vmul.f32 1.442695, %v1219_v4 }
 0x30e   : > { %v1316_v9 = vmul.f32 1.442695, %v1315_v5  ;;  %v1428_v48 = vmul.f32 1.442695, %v1427_v47  ;;  %v3086_v4 = vld [vmem:[%s4012_s11] sm:$0xff]   ;;  %v3089_v5 = vld [vmem:[%s4012_s11 + $0x18] sm:$0xff]  }
 0x30f   : > { %3122 = vpow2.f32 %v1031_v6  ;;  %v3092_v6 = vld [vmem:[%s4005_s4 + $0x24] ss:$8 sps:$4 sm:$0xff]  }
 0x310   : > { %3124 = vpow2.f32 %v1124_v7  ;;  %v3093_v7 = vld [vmem:[%s4003_s2 + $0x10] sm:$0xff]  }
 0x311   : > { %3126 = vpow2.f32 %v1220_v8 }
 0x312   : > { %3128 = vpow2.f32 %v1316_v9 }
 0x313   : > { %3130 = vpow2.f32 %v1428_v48 }
 0x319   : > { %v3123_v10 = vpop.eup %3122 }
 0x31a   : > { %v3125_v12 = vpop.eup %3124  ;;  %v1033_v13 = vmul.f32 %v3123_v10, %v3677_v18 }
 0x31b   : > { %v3127_v14 = vpop.eup %3126  ;;  %v1126_v15 = vmul.f32 %v3125_v12, %v3677_v18  ;;  %v2727_v12 = vld [vmem:[%s4011_s10] ss:$0 sm:$0xff] }
 0x31c   : > { %v3129_v21 = vpop.eup %3128  ;;  %v1034_v23 = vmul.f32 %v1033_v13, %v903_v42  ;;  %v1222_v26 = vmul.f32 %v3127_v14, %v3677_v18 }
 0x31d   : > { %v1127_v22 = vmul.f32 %v1126_v15, %v903_v42  ;;  %v1318_v28 = vmul.f32 %v3129_v21, %v3677_v18  ;;  %v3131_v49 = vpop.eup %3130  ;;  %v3090_v15 = vld [vmem:[%s4005_s4 + $0x20] ss:$8 sps:$4 sm:$0xff]  }
 0x31e   : > { %2876 = vmatmul.mubr.msk.f32.vlgmr.msra.gmra.mrb[14].mxu1 %vm914_vm6, %v1034_v23  ;;  %v1223_v32 = vmul.f32 %v1222_v26, %v903_v42  ;;  %v1430_v50 = vadd.f32 1.0, %v3131_v49  ;;  %v3096_v23 = vld [vmem:[%s4005_s4 + $0x34] ss:$8 sps:$4 sm:$0xff]   ;;  %v3094_v26 = vld [vmem:[%s4005_s4 + $0x30] ss:$8 sps:$4 sm:$0xff]  }
 0x31f   : > { %2881 = vmatmul.mubr.msk.f32.vlgmr.msra.gmra.mrb[8].mxu0 %vm914_vm6, %v1127_v22  ;;  %2884 = vmatpush3.msra.mxu1 %v1231_v11  ;;  %v1319_v33 = vmul.f32 %v1318_v28, %v903_v42  ;;  %v3097_v22 = vld [vmem:[%s4003_s2 + $0x18] sm:$0xff]  }
 0x320   : > { %2889 = vmatpush3.msra.mxu0 %v1327_v35  ;;  %2885 = vmatprep.mubr.msk.f32.mxu1 %vm3330_vm0, %v3329_v0  ;;  %3132 = vrcp.f32 %v1430_v50  ;;  %v3098_v35 = vld [vmem:[#allocation2 + $0x10] sm:$0xff]  }
 0x321   : > { %2890 = vmatprep.mubr.msk.f32.mxu0 %vm3330_vm0, %v3329_v0  ;;  %2893 = vmatprep.subr.bf16.mxu1 %v3329_v0 }
 0x322   : > { %2886 = vmatmul.mubr.msk.f32.vlgmr.msra.gmra.mrb[16].mxu1 %vm914_vm6, %v1223_v32  ;;  %2905 = vmatprep.subr.bf16.mxu0 %v3329_v0 }
 0x323   : > { %2891 = vmatmul.mubr.msk.f32.vlgmr.msra.gmra.mrb[10].mxu0 %vm914_vm6, %v1319_v33  ;;  %2901 = vmatprep.mubr.msk.bf16.mxu1 %vm3330_vm0, %v3329_v0 }
 0x324   : > { %2909 = vmatprep.mubr.msk.bf16.mxu0 %vm3330_vm0, %v3329_v0  ;;  %2894 = vmatpush3.bf16.msra.mxu1 %v3086_v4 }
 0x325   : > { %2895 = vmatprep.subr.bf16.mxu1 %v3329_v0  ;;  %2906 = vmatpush3.bf16.msra.mxu0 %v3093_v7 }
 0x326   : > { %2907 = vmatprep.subr.bf16.mxu0 %v3329_v0 }
 0x328   : > { %2896 = vmatpush3.bf16.msra.mxu1 %v3087_v34 }
 0x329   : > { %2897 = vmatprep.subr.bf16.mxu1 %v3329_v0  ;;  %2908 = vmatpush3.bf16.msra.mxu0 %v3097_v22 }
 0x32a   : > { %v3133_v55 = vpop.eup %3132  ;;  %2913 = vmatprep.subr.bf16.mxu0 %v3329_v0 }
 0x32b   : > { %v1432_v61 = vmul.f32 %v3133_v55, %v3615_v20  ;;  %v3088_v20 = vld [vmem:[%s4012_s11 + $0x10] sm:$0xff]  }
 0x32c   : > { %2898 = vmatpush3.bf16.msra.mxu1 %v3088_v20 }
 0x32d   : > { %2899 = vmatprep.subr.bf16.mxu1 %v3329_v0 }
 0x330   : > { %2900 = vmatpush3.bf16.msra.mxu1 %v3089_v5 }
 0x331   : > { %1670 = vmatprep.subr.bf16.mxu1 %v3092_v6 }
 0x3f1   : > { %v1110_v37 = vpop.f32.mrb[14].mxu1 }
 0x3f2   : > { %v1206_v38 = vpop.f32.mrb[8].mxu0  ;;  %v2877_v39 = vpop.f32.mrb[15].mxu1 }
 0x3f3   : > { %1403 = vrot.lane.b32.xlu0 %v1206_v38, %s3338_s27  ;;  %v2882_v40 = vpop.f32.mrb[9].mxu0  ;;  %v3099_v39 = vld [vmem:[#allocation2 + $0x18] sm:$0xff]  }
 0x3f4   : > { %v3100_v40 = vld [vmem:[%s4006_s5 + $0x10] sm:$0xff]  }
 0x3f5   : > { %v1302_v42 = vpop.f32.mrb[16].mxu1 }
 0x3f6   : > { %v1398_v43 = vpop.f32.mrb[10].mxu0  ;;  %v2887_v44 = vpop.f32.mrb[17].mxu1 }
 0x3f7   : > { %v2892_v45 = vpop.f32.mrb[11].mxu0  ;;  %1407 = vrot.lane.b32.xlu0 %v1302_v42, %s3339_s17  ;;  %v3101_v42 = vld [vmem:[%s4006_s5 + $0x18] sm:$0xff]  }
 0x3fb   : > { %1411 = vrot.lane.b32.xlu0 %v1398_v43, %s3340_s20  ;;  %v1754_v43 = vld [vmem:[#allocation7 + $0x8] sm:$0xff] }
 0x3fc   : > { %v1759_v44 = vrot.slane %v1754_v43, %v3618_v24  ;;  %v1787_v45 = vrot.slane %v1754_v43, %v3622_v27  ;;  %v1763_v47 = vrot.slane %v1754_v43, %v696_v25  ;;  %v1791_v48 = vrot.slane %v1754_v43, %v724_v29 }
 0x3fd   : > { %v1815_v49 = vrot.slane %v1754_v43, %v3627_v30  ;;  %v1819_v50 = vrot.slane %v1754_v43, %v752_v31  ;;  %v1841_v20 = vrot.slane %v1754_v43, %v774_v46 }
 0x3fe   : > { %v1769_v54 = vrot.slane %v1759_v44, %v3618_v24  ;;  %v1797_v55 = vrot.slane %v1787_v45, %v3622_v27  ;;  %v1773_v25 = vrot.slane %v1763_v47, %v3618_v24  ;;  %v1801_v29 = vrot.slane %v1791_v48, %v3622_v27 }
 0x3ff   : > { %v1829_v34 = vrot.slane %v1819_v50, %v3627_v30 }
 0x465   : > { %v1404_v51 = vpop.permute.xlu0 %1403 }
 0x466   : > { %v1415_v56 = vsel %vm1414_vm7, %v1110_v37, %v1404_v51 }
 0x469   : > { %v1408_v52 = vpop.permute.xlu0 %1407 }
 0x46a   : > { %v1416_v57 = vsel %vm481_vm1, %v1415_v56, %v1408_v52 }
 0x46d   : > { %v1412_v59 = vpop.permute.xlu0 %1411 }
 0x46e   : > { %v1418_v60 = vsel %vm1417_vm8, %v1416_v57, %v1412_v59 }
 0x46f   : > { %v1426_v62 = vadd.f32 %v1425_v58, %v1418_v60  ;;  %v1825_v60 = vrot.slane %v1815_v49, %v3627_v30 }
 0x471   : > { %v1433_v63 = vmul.f32 %v1432_v61, %v1426_v62  ;;  %v1837_v61 = vrot.slane %v1754_v43, %v3647_v41 }
 0x473   : > { %v1434_v2 = vmul.f32 %v1433_v63, %v1433_v63 }
 0x475   : > { %v1436_v3 = vsel %vm1435_vm9, %v1434_v2, 0.0 }
 0x476   : > { %1437 = vadd.xlane.f32.xlu0 %v1436_v3 }
 0x503   : > { %v1438_v8 = vpop.xlane.xlu0 %1437 }
 0x504   : > { %v1440_v9 = vmul.f32 0.015625, %v1438_v8 }
 0x506   : > { %v1441_v10 = vadd.f32 1e-05, %v1440_v9 }
 0x508   : > { %3134 = vrsqrt.f32 %v1441_v10 }
 0x512   : > { %v3135_v11 = vpop.eup %3134 }
 0x513   : > { %v1443_v13 = vmul.f32 %v3135_v11, %v1433_v63 }
 0x515   : > { %v1450_v14 = vmul.f32 %v2727_v12, %v1443_v13 }
 0x517   : > { %v1451_v21 = vpack.c.bf16 %v1450_v14, %v1450_v14 }
 0x519   : > { %2902 = vmatmul.mubr.msk.bf16.vlgmr.msra.gmra.mrb[20].mxu1 %vm1435_vm9, %v1451_v21 }
 0x51a   : > { %1671 = vmatpush1.bf16.msra.mxu1 %v3090_v15  ;;  %1702 = vmatprep.mubr.bf16.mxu1 %v3331_v1  ;;  %v1847_v15 = vrot.slane %v1837_v61, %v3647_v41 }
 0x51b   : > { %1672 = vmatprep.subr.bf16.mxu1 %v3096_v23 }
 0x51e   : > { %1673 = vmatpush1.bf16.msra.mxu1 %v3094_v26  ;;  %v1851_v26 = vrot.slane %v1841_v20, %v3647_v41 }
 0x51f   : > { %2929 = vmatprep.subr.bf16.mxu1 %v3329_v0 }
 0x5ec   : > { %v1521_v28 = vpop.f32.mrb[20].mxu1 }
 0x5ed   : > { %v1527_v32 = vpack.c.bf16 %v1521_v28, %v1521_v28  ;;  %v2903_v33 = vpop.f32.mrb[21].mxu1 }
 0x5ee   : > { %v1524_v37 = vpop.f32.mrb[22].mxu1  ;;  %v2756_v33 = vld [vmem:[%s4009_s8 + $0x2] sm:$0x3] }
 0x5ef   : > { %v2904_v38 = vpop.f32.mrb[23].mxu1  ;;  %2910 = vmatmul.mubr.msk.bf16.vlgmr.msra.gmra.mrb[12].mxu0 %vm481_vm1, %v1527_v32  ;;  %2751 = vmatmul.mubr.msk.bf16.vlgmr.msra.gmra.mrb[24].mxu1 %vm481_vm1, %v1527_v32 }
 0x5f0   : > { %2914 = vmatpush3.bf16.msra.mxu0 %v3098_v35  ;;  %2917 = vmatprep.mubr.msk.bf16.mxu0 %vm3330_vm0, %v3329_v0 }
 0x5f1   : > { %2915 = vmatprep.subr.bf16.mxu0 %v3329_v0  ;;  %2931 = vmatprep.mubr.msk.bf16.mxu1 %vm3330_vm0, %v3329_v0 }
 0x5f4   : > { %2916 = vmatpush3.bf16.msra.mxu0 %v3099_v39 }
 0x5f5   : > { %2921 = vmatprep.subr.bf16.mxu0 %v3329_v0 }
 0x5f7   : > { %2918 = vmatmul.mubr.msk.bf16.vlgmr.msra.gmra.mrb[16].mxu0 %vm481_vm1, %v1527_v32 }
 0x5f8   : > { %2922 = vmatpush3.bf16.msra.mxu0 %v3100_v40  ;;  %2925 = vmatprep.mubr.msk.bf16.mxu0 %vm3330_vm0, %v3329_v0 }
 0x5f9   : > { %2923 = vmatprep.subr.bf16.mxu0 %v3329_v0 }
 0x5fc   : > { %2924 = vmatpush3.bf16.msra.mxu0 %v3101_v42  ;;  %v1871_v42 = vrot.slane %v2756_v33, %v3627_v30 }
 0x5fd   : > { %2935 = vmatprep.subr.mxu0 %v3329_v0 }
 0x5ff   : > { %2926 = vmatmul.mubr.msk.bf16.vlgmr.msra.gmra.mrb[20].mxu0 %vm481_vm1, %v1527_v32 }
 0x600   : > { %2937 = vmatprep.mubr.msk.f32.mxu0 %vm3330_vm0, %v3329_v0 }
 0x6c2   : > { %v3829_v51 = vpop.f32.mrb[12].mxu0  ;;  %v1704_v52 = vpop.f32.mrb[24].mxu1 }
 0x6c3   : > { %v1778_v56 = vrot.slane %v1704_v52, 7  ;;  %v1806_v57 = vrot.slane %v1704_v52, 6  ;;  %v2911_v58 = vpop.f32.mrb[13].mxu0  ;;  %v1706_v59 = vpop.f32.mrb[25].mxu1  ;;  %v1774_v7 = vmul.f32 %v1769_v54, %v1704_v52 }
 0x6c4   : > { %v1779_v31 = vrot.slane %v1706_v59, 7  ;;  %v1807_v62 = vrot.slane %v1706_v59, 6  ;;  %v1585_v63 = vpop.f32.mrb[14].mxu0  ;;  %v1708_v2 = vpop.f32.mrb[26].mxu1  ;;  %v1775_v11 = vmul.f32 %v1773_v25, %v1706_v59 }
 0x6c5   : > { %v1782_v3 = vsel %vm659_vm2, 0.0, %v1778_v56  ;;  %v1810_v4 = vsel %vm669_vm3, 0.0, %v1806_v57  ;;  %v2912_v5 = vpop.f32.mrb[15].mxu0  ;;  %v1709_v6 = vpop.f32.mrb[27].mxu1  ;;  %v1981_v2 = vrot.slane %v2756_v33, %v3622_v27 }
 0x6c6   : > { %v1802_v8 = vmul.f32 %v1797_v55, %v1782_v3  ;;  %v1783_v9 = vsel %vm659_vm2, 0.0, %v1779_v31  ;;  %v1811_v10 = vsel %vm669_vm3, 0.0, %v1807_v62  ;;  %v1830_v14 = vmul.f32 %v1825_v60, %v1810_v4  ;;  %v1717_v6 = vld [vmem:[#allocation5 + $0x4] sm:$0xf] }
 0x6c7   : > { %v1803_v12 = vmul.f32 %v1801_v29, %v1783_v9  ;;  %v1831_v23 = vmul.f32 %v1829_v34, %v1811_v10  ;;  %v1721_v9 = vrot.slane %v1717_v6, %v3618_v24 }
 0x6c8   : > { %v1804_v13 = vadd.f32 %v1802_v8, %v1774_v7  ;;  %v1730_v7 = vrot.slane %v1717_v6, %v3622_v27 }
 0x6c9   : > { %v1805_v21 = vadd.f32 %v1803_v12, %v1775_v11 }
 0x6ca   : > { %v1832_v19 = vadd.f32 %v1830_v14, %v1804_v13  ;;  %v3846_v46 = vpop.f32.mrb[16].mxu0  ;;  %v1739_v13 = vrot.slane %v1717_v6, %v3627_v30 }
 0x6cb   : > { %v1833_v22 = vadd.f32 %v1831_v23, %v1805_v21  ;;  %v2919_v28 = vpop.f32.mrb[17].mxu0  ;;  %v1724_v5 = vrot.slane %v3846_v46, 7  ;;  %v1733_v10 = vrot.slane %v3846_v46, 6  ;;  %v1722_v12 = vmul.f32 %v1721_v9, %v3846_v46 }
 0x6cc   : > { %v1852_v35 = vadd.f32 %v1847_v15, %v1832_v19  ;;  %v1642_v32 = vpop.f32.mrb[18].mxu0 }
 0x6cd   : > { %v1853_v37 = vadd.f32 %v1851_v26, %v1833_v22  ;;  %v2920_v38 = vpop.f32.mrb[19].mxu0  ;;  %v1726_v8 = vsel %vm659_vm2, 0.0, %v1724_v5  ;;  %v1735_v14 = vsel %vm669_vm3, 0.0, %v1733_v10  ;;  %v1745_v26 = vrot.slane %v1717_v6, %v3647_v41 }
 0x6ce   : > { %v1854_v39 = vsub.f32 0.0, %v1852_v35  ;;  %v1731_v11 = vmul.f32 %v1730_v7, %v1726_v8  ;;  %v1740_v21 = vmul.f32 %v1739_v13, %v1735_v14 }
 0x6cf   : > { %v1855_v40 = vsub.f32 0.0, %v1853_v37 }
 0x6d0   : > { %v1856_v43 = vmul.f32 1.442695, %v1854_v39  ;;  %v1732_v15 = vadd.f32 %v1731_v11, %v1722_v12 }
 0x6d1   : > { %v1858_v44 = vmul.f32 1.442695, %v1855_v40 }
 0x6d2   : > { %3136 = vpow2.f32 %v1856_v43  ;;  %v1918_v45 = vpop.f32.mrb[20].mxu0  ;;  %v1741_v23 = vadd.f32 %v1740_v21, %v1732_v15 }
 0x6d3   : > { %3138 = vpow2.f32 %v1858_v44  ;;  %v1919_v47 = vadd.f32 %v1918_v45, %v1871_v42  ;;  %v2927_v48 = vpop.f32.mrb[21].mxu0 }
 0x6d4   : > { %v1921_v49 = vpop.f32.mrb[22].mxu0  ;;  %v1746_v19 = vadd.f32 %v1745_v26, %v1741_v23 }
 0x6d5   : > { %v1925_v50 = vmin.f32 %v1919_v47, 20.0  ;;  %v2928_v52 = vpop.f32.mrb[23].mxu0  ;;  %vm1924_vm10 = vcmp.gt.f32.partialorder %v1919_v47, 20.0 }
 0x6d6   : > { %v1747_v22 = vsub.f32 0.0, %v1746_v19 }
 0x6d7   : > { %v1926_v54 = vmul.f32 1.442695, %v1925_v50 }
 0x6d8   : > { %v1748_v28 = vmul.f32 1.442695, %v1747_v22 }
 0x6d9   : > { %3140 = vpow2.f32 %v1926_v54 }
 0x6dc   : > { %v3137_v55 = vpop.eup %3136 }
 0x6dd   : > { %v3139_v56 = vpop.eup %3138  ;;  %v1860_v57 = vadd.f32 1.0, %v3137_v55 }
 0x6de   : > { %v1861_v58 = vadd.f32 1.0, %v3139_v56 }
 0x6df   : > { %3142 = vrcp.f32 %v1860_v57 }
 0x6e0   : > { %3144 = vrcp.f32 %v1861_v58 }
 0x6e3   : > { %v3141_v59 = vpop.eup %3140 }
 0x6e4   : > { %v1928_v25 = vadd.f32 1.0, %v3141_v59 }
 0x6e6   : > { %3146 = vlog2.f32 %v1928_v25 }
 0x6e7   : > { %3148 = vpow2.f32 %v1748_v28 }
 0x6e9   : > { %v3143_v29 = vpop.eup %3142 }
 0x6ea   : > { %v1863_v60 = vmul.f32 %v3143_v29, %v1852_v35  ;;  %v3145_v61 = vpop.eup %3144 }
 0x6eb   : > { %v1865_v62 = vmul.f32 %v3145_v61, %v1853_v37 }
 0x6ec   : > { %v1937_v31 = vpack.c.bf16 %v1863_v60, %v1863_v60 }
 0x6ed   : > { %v1936_v34 = vpack.c.bf16 %v1865_v62, %v1865_v62 }
 0x6ee   : > { %2930 = vmatpush3.bf16.xpose.msra.mxu1 %v1937_v31 }
 0x6ef   : > { %2945 = vmatprep.subr.mxu1 %v3329_v0 }
 0x6f0   : > { %v3147_v63 = vpop.eup %3146 }
 0x6f1   : > { %v1930_v3 = vmul.f32 0.6931472, %v3147_v63  ;;  %v3149_v38 = vpop.eup %3148 }
 0x6f2   : > { %v1750_v40 = vadd.f32 1.0, %v3149_v38 }
 0x6f3   : > { %v1931_v4 = vsel %vm1924_vm10, %v1919_v47, %v1930_v3 }
 0x6f4   : > { %v1982_v20 = vmul.f32 %v1981_v2, %v1931_v4  ;;  %2290 = vperm.xlu0 %3066, %v1931_v4   ;;  %2194 = vperm.xlu1 %3065, %v1931_v4   ;;  %3150 = vrcp.f32 %v1750_v40 }
 0x6f5   : > { %2932 = vmatmul.mubr.bf16.vlgmr.msra.gmra.mrb[28].mxu1 %v1936_v34 }
 0x6f6   : > { %2936 = vmatpush3.msra.mxu0 %v1982_v20  ;;  %2947 = vmatprep.mubr.msk.f32.mxu1 %vm3330_vm0, %v3329_v0 }
 0x6f7   : > { %2938 = vmatmul.mubr.msk.f32.vlgmr.msra.gmra.mrb[24].mxu0 %vm914_vm6, %v3677_v18  ;;  %2940 = vmatprep.subr.mxu0 %v3329_v0 }
 0x6f8   : > { %3067 = vset.pattern.permute.xlu1 %v3332_v16  ;;  %2942 = vmatprep.mubr.msk.f32.mxu0 %vm3330_vm0, %v3329_v0 }
 0x6f9   : > { %2386 = vperm.xlu1 %3067, %v1931_v4  }
 0x6fd   : > { %3068 = vset.pattern.permute.xlu1 %v3331_v1 }
 0x6fe   : > { %v3151_v42 = vpop.eup %3150 }
 0x6ff   : > { %v3878_v44 = vmul.f32 %v3151_v42, %v1746_v19 }
 0x773   : > { %v2195_v43 = vpop.permute.xlu1 %2194  ;;  %v2291_v47 = vpop.permute.xlu0 %2290 }
 0x774   : > { %v2197_v45 = vmul.f32 %v2195_v43, %v3878_v44 }
 0x778   : > { %v2387_v48 = vpop.permute.xlu1 %2386 }
 0x7c8   : > { %v3872_v35 = vpop.f32.mrb[28].mxu1 }
 0x7c9   : > { %v2933_v32 = vpop.f32.mrb[29].mxu1 }
 0x7ca   : > { %v1975_v33 = vpop.f32.mrb[30].mxu1  ;;  %v2049_v37 = vpop.f32.mrb[24].mxu0  ;;  %v2490_v32 = vsub.f32 0.0, %v3829_v51 }
 0x7cb   : > { %2053 = vxpose.xlu0.b32.start.end [1/1] (short) (narrow) %v2049_v37, 8  ;;  %2087 = vperm.xlu1 %3068, %v2049_v37   ;;  %v2934_v46 = vpop.f32.mrb[31].mxu1  ;;  %v2939_v39 = vpop.f32.mrb[25].mxu0 }
 0x7cc   : > { %v2491_v33 = vmul.f32 1.442695, %v2490_v32  ;;  %v2767_v39 = vld [vmem:[%s4010_s9 + $0x1] ss:$0 sm:$0xff] }
 0x7cf   : > { %3069 = vset.pattern.permute.xlu1 %v3333_v17  ;;  %v2293_v17 = vmul.f32 %v2291_v47, %v3878_v44 }
 0x7d0   : > { %2180 = vperm.xlu1 %3069, %v2049_v37  }
 0x7d4   : > { %3070 = vset.pattern.permute.xlu1 %v3334_v36  ;;  %v2389_v36 = vmul.f32 %v2387_v48, %v3878_v44 }
 0x7d5   : > { %2276 = vperm.xlu1 %3070, %v2049_v37  }
 0x7d9   : > { %3071 = vset.pattern.permute.xlu1 %v3332_v16 }
 0x7da   : > { %2372 = vperm.xlu1 %3071, %v2049_v37  }
 0x7de   : > { %3072 = vset.pattern.permute.xlu1 %v3331_v1 }
 0x7df   : > { %2102 = vperm.xlu1 %3072, %v1931_v4  }
 0x7e3   : > { %2199 = vrot.lane.b32.xlu1 %v2197_v45, %s3336_s19  ;;  %v2488_v45 = vmul.f32 %v2767_v39, %v3878_v44 }
 0x7e7   : > { %2295 = vrot.lane.b32.xlu1 %v2293_v17, %s3335_s16  ;;  %s2604_s16 = sshll.u32 %s448_s21, 4  ;;  %s3960_s16 = int_to_ptr.vmem [resolvable:$true] %s2604_s16 }
 0x7e8   : > { %s3250_s24 = scalar_lea.vmem %s3960_s16, 128  ;;  %p3257_p13 = scmp.lt.s32.totalorder %s3960_s16, %s3255_s13 }
 0x7e9   : > { %p3251_p12 = scmp.ne.s32.totalorder %s3960_s16, %s3250_s24  ;;  %p3258_p1 = scmp.lt.s32.totalorder %s3256_s29, %s3250_s24 }
 0x7eb   : > { %2391 = vrot.lane.b32.xlu1 %v2389_v36, %s3337_s26  ;;  %p3252_p8 = pnand %p3251_p12, %p4048_p7  ;;  %p3259_p6 = por %p3258_p1, %p3257_p13 }
 0x7ed   : > { %p3253_p11 = pneg %p3252_p8 }
 0x7ef   : > { %p3260_p9 = pnand %p3259_p6, %p3253_p11 }
 0x7f4   : > { %3073 = vset.pattern.permute.xlu0 %v3332_v16 }
 0x84a   : > { %v2088_v1 = vpop.permute.xlu1 %2087 }
 0x84b   : > { %v2069_v49 = vpop.trf.xlu0 }
 0x84c   : > { %v2093_v50 = vrot.slane %v2069_v49, %v3627_v30  ;;  %v2186_v52 = vrot.slane %v2069_v49, %v3622_v27  ;;  %v2282_v16 = vrot.slane %v2069_v49, %v3618_v24  ;;  %v2378_v61 = vrot.slane %v2069_v49, %v3647_v41 }
 0x84e   : > { %v2094_v54 = vsub.f32 %v2088_v1, %v2093_v50 }
 0x84f   : > { %v2181_v55 = vpop.permute.xlu1 %2180 }
 0x850   : > { %v2095_v56 = vsel %vm3670_vm4, %v2094_v54, 0.0  ;;  %v2187_v57 = vsub.f32 %v2181_v55, %v2186_v52  ;;  %v3102_v52 = vld [vmem:[%s4012_s11 + $0x20] sm:$0xff]   ;;  %v3105_v54 = vld [vmem:[%s4012_s11 + $0x38] sm:$0xff]  }
 0x851   : > { %v2096_v58 = vmul.f32 1.442695, %v2095_v56 }
 0x852   : > { %v2188_v59 = vsel %vm3670_vm4, %v2187_v57, 0.0 }
 0x853   : > { %3152 = vpow2.f32 %v2096_v58  ;;  %v2189_v25 = vmul.f32 1.442695, %v2188_v59  ;;  %v2768_v59 = vld [vmem:[%s4011_s10 + $0x1] ss:$0 sm:$0xff] }
 0x854   : > { %v2277_v29 = vpop.permute.xlu1 %2276 }
 0x855   : > { %3154 = vpow2.f32 %v2189_v25  ;;  %v2283_v60 = vsub.f32 %v2277_v29, %v2282_v16 }
 0x857   : > { %v2284_v27 = vsel %vm3670_vm4, %v2283_v60, 0.0 }
 0x858   : > { %v2285_v30 = vmul.f32 1.442695, %v2284_v27 }
 0x859   : > { %v2373_v31 = vpop.permute.xlu1 %2372 }
 0x85a   : > { %3156 = vpow2.f32 %v2285_v30  ;;  %v2379_v62 = vsub.f32 %v2373_v31, %v2378_v61 }
 0x85c   : > { %v2380_v63 = vsel %vm3670_vm4, %v2379_v62, 0.0 }
 0x85d   : > { %v3153_v2 = vpop.eup %3152  ;;  %v2381_v3 = vmul.f32 1.442695, %v2380_v63 }
 0x85e   : > { %v2103_v4 = vpop.permute.xlu1 %2102  ;;  %v2098_v24 = vmul.f32 %v3153_v2, %v3677_v18 }
 0x85f   : > { %v3155_v34 = vpop.eup %3154  ;;  %3158 = vpow2.f32 %v2381_v3  ;;  %v2105_v20 = vmul.f32 %v2103_v4, %v3878_v44  ;;  %v3103_v44 = vld [vmem:[%s4012_s11 + $0x28] sm:$0xff]  }
 0x860   : > { %v2099_v5 = vmul.f32 %v2098_v24, %v3872_v35  ;;  %v2191_v6 = vmul.f32 %v3155_v34, %v3677_v18  ;;  %3160 = vpow2.f32 %v2491_v33 }
 0x861   : > { %2941 = vmatpush3.msra.mxu0 %v2105_v20 }
 0x862   : > { %v2200_v41 = vpop.permute.xlu1 %2199  ;;  %2943 = vmatmul.mubr.msk.f32.vlgmr.msra.gmra.mrb[26].mxu0 %vm914_vm6, %v2099_v5  ;;  %v2192_v53 = vmul.f32 %v2191_v6, %v3872_v35  ;;  %2950 = vmatprep.subr.mxu0 %v3329_v0 }
 0x863   : > { %2946 = vmatpush3.msra.mxu1 %v2200_v41  ;;  %2952 = vmatprep.mubr.msk.f32.mxu0 %vm3330_vm0, %v3329_v0 }
 0x864   : > { %v3157_v7 = vpop.eup %3156  ;;  %2948 = vmatmul.mubr.msk.f32.vlgmr.msra.gmra.mrb[18].mxu1 %vm914_vm6, %v2192_v53  ;;  %2955 = vmatprep.subr.mxu1 %v3329_v0 }
 0x865   : > { %v2287_v8 = vmul.f32 %v3157_v7, %v3677_v18  ;;  %2957 = vmatprep.mubr.msk.f32.mxu1 %vm3330_vm0, %v3329_v0 }
 0x866   : > { %v2296_v9 = vpop.permute.xlu1 %2295 }
 0x867   : > { %2951 = vmatpush3.msra.mxu0 %v2296_v9  ;;  %v2288_v10 = vmul.f32 %v2287_v8, %v3872_v35 }
 0x868   : > { %2960 = vmatprep.subr.bf16.mxu0 %v3329_v0 }
 0x869   : > { %v3159_v11 = vpop.eup %3158  ;;  %2953 = vmatmul.mubr.msk.f32.vlgmr.msra.gmra.mrb[28].mxu0 %vm914_vm6, %v2288_v10 }
 0x86a   : > { %v2392_v12 = vpop.permute.xlu1 %2391  ;;  %v2383_v13 = vmul.f32 %v3159_v11, %v3677_v18  ;;  %2968 = vmatprep.mubr.msk.bf16.mxu0 %vm3330_vm0, %v3329_v0  ;;  %2961 = vmatpush3.bf16.msra.mxu0 %v3102_v52 }
 0x86b   : > { %2956 = vmatpush3.msra.mxu1 %v2392_v12  ;;  %2962 = vmatprep.subr.bf16.mxu0 %v3329_v0 }
 0x86c   : > { %v2384_v14 = vmul.f32 %v2383_v13, %v3872_v35  ;;  %v3161_v35 = vpop.eup %3160 }
 0x86d   : > { %v2493_v37 = vadd.f32 1.0, %v3161_v35 }
 0x86e   : > { %2958 = vmatmul.mubr.msk.f32.vlgmr.msra.gmra.mrb[32].mxu1 %vm914_vm6, %v2384_v14  ;;  %2963 = vmatpush3.bf16.msra.mxu0 %v3103_v44 }
 0x86f   : > { %3162 = vrcp.f32 %v2493_v37  ;;  %2964 = vmatprep.subr.bf16.mxu0 %v3329_v0 }
 0x879   : > { %v3163_v40 = vpop.eup %3162 }
 0x87a   : > { %v2495_v48 = vmul.f32 %v3163_v40, %v3829_v51  ;;  %v3104_v51 = vld [vmem:[%s4012_s11 + $0x30] sm:$0xff]  }
 0x87b   : > { %2965 = vmatpush3.bf16.msra.mxu0 %v3104_v51 }
 0x87c   : > { %2966 = vmatprep.subr.bf16.mxu0 %v3329_v0 }
 0x87f   : > { %2967 = vmatpush3.bf16.msra.mxu0 %v3105_v54 }
 0x935   : > { %v2175_v15 = vpop.f32.mrb[26].mxu0 }
 0x936   : > { %v2944_v21 = vpop.f32.mrb[27].mxu0 }
 0x937   : > { %v2271_v23 = vpop.f32.mrb[18].mxu1 }
 0x938   : > { %2468 = vrot.lane.b32.xlu1 %v2271_v23, %s3338_s27  ;;  %v2949_v26 = vpop.f32.mrb[19].mxu1  ;;  %s4047_s27 = sld [smem:[#allocation19_spill]] }
 0x93c   : > { %v2367_v19 = vpop.f32.mrb[28].mxu0 }
 0x93d   : > { %v2954_v22 = vpop.f32.mrb[29].mxu0  ;;  %2472 = vrot.lane.b32.xlu1 %v2367_v19, %s3339_s17 }
 0x93e   : > { %s3958_s17 = scalar_lea.hbm %s4047_s27, %s2783_s28 }
 0x941   : > { %v2463_v28 = vpop.f32.mrb[32].mxu1 }
 0x942   : > { %2476 = vrot.lane.b32.xlu1 %v2463_v28, %s3340_s20  ;;  %v2959_v18 = vpop.f32.mrb[33].mxu1  ;;  %s2591_s20 = scalar_lea.sflag [#allocation4], %s446_s15 }
 0x9aa   : > { %v2469_v38 = vpop.permute.xlu1 %2468 }
 0x9ab   : > { %v2479_v42 = vsel %vm1414_vm7, %v2175_v15, %v2469_v38 }
 0x9af   : > { %v2473_v46 = vpop.permute.xlu1 %2472 }
 0x9b0   : > { %v2480_v43 = vsel %vm481_vm1, %v2479_v42, %v2473_v46 }
 0x9b4   : > { %v2477_v47 = vpop.permute.xlu1 %2476 }
 0x9b5   : > { %v2481_v17 = vsel %vm1417_vm8, %v2480_v43, %v2477_v47 }
 0x9b6   : > { %v2489_v36 = vadd.f32 %v2488_v45, %v2481_v17 }
 0x9b8   : > { %v2496_v1 = vmul.f32 %v2495_v48, %v2489_v36 }
 0x9ba   : > { %v2497_v49 = vmul.f32 %v2496_v1, %v2496_v1 }
 0x9bc   : > { %v2498_v50 = vsel %vm1435_vm9, %v2497_v49, 0.0 }
 0x9bd   : > { %2499 = vadd.xlane.f32.xlu1 %v2498_v50 }
 0xa4a   : > { %v2500_v55 = vpop.xlane.xlu1 %2499 }
 0xa4b   : > { %v2501_v56 = vmul.f32 0.015625, %v2500_v55 }
 0xa4d   : > { %v2502_v57 = vadd.f32 1e-05, %v2501_v56 }
 0xa4f   : > { %3164 = vrsqrt.f32 %v2502_v57 }
 0xa59   : > { %v3165_v58 = vpop.eup %3164 }
 0xa5a   : > { %v2504_v25 = vmul.f32 %v3165_v58, %v2496_v1 }
 0xa5c   : > { %v2511_v16 = vmul.f32 %v2768_v59, %v2504_v25 }
 0xa5e   : > { %v2512_v29 = vpack.c.bf16 %v2511_v16, %v2511_v16 }
 0xa60   : > { %2969 = vmatmul.mubr.msk.bf16.vlgmr.msra.gmra.mrb[32].mxu0 %vm1435_vm9, %v2512_v29 }
 0xb33   : > { %v2583_v0 = vpop.f32.mrb[32].mxu0 }
 0xb34   : > { %2589 = vst.msk [vmem:[%s448_s21] sm:$0xff] %vm481_vm1, %v2583_v0  ;;  %v2970_v60 = vpop.f32.mrb[33].mxu0 }
 0xb35   : > { %v2586_v27 = vpop.f32.mrb[34].mxu0 }
 0xb36   : > { %3263 = shalt.err (!%p3260_p9)
}
 0xb37   : > { %s3264_s30 = scalar_lea.hbm %s3958_s17, 128  ;;  %s3268_s15 = scalar_lea.hbm %s4047_s27, 256 }
 0xb38   : > { %p3265_p2 = scmp.ne.s32.totalorder %s3958_s17, %s3264_s30  ;;  %p3269_p5 = scmp.lt.u32.totalorder %s3958_s17, %s4047_s27 }
 0xb39   : > { %p3270_p10 = scmp.lt.u32.totalorder %s3268_s15, %s3264_s30  ;;  %p3272_p12 = scmp.lt.u32.totalorder %s3264_s30, %s3958_s17 }
 0xb3a   : > { %p3266_p3 = pnand %p3265_p2, %p4048_p7 }
 0xb3b   : > { %p3271_p4 = por %p3270_p10, %p3269_p5 }
 0xb3c   : > { %p3267_p0 = pneg %p3266_p3 }
 0xb3d   : > { %p3273_p8 = por %p3272_p12, %p3271_p4 }
 0xb3f   : > { %p3274_p11 = pnand %p3273_p8, %p3267_p0 }
 0xb41   : > { %3277 = shalt.err (!%p3274_p11)
}
 0xb42   : > { %2984 = dma.vmem_to_hbm [thread:$0]  (%p4048_p7), %s3960_s16, 128, %s3958_s17, %s2591_s20   ;;  %v2971_v30 = vpop.f32.mrb[35].mxu0 }
 0xb43 PF: > { %s4049_s21 = sld [smem:[#allocation14_spill]]  ;;  %s4050_s19 = sld [smem:[#allocation12_spill]] }
 0xb44   : > { %s4051_s26 = sld [smem:[#allocation18_spill]] }
 0xb49   : > { %p3006_p13 = scmp.ge.s32.totalorder %s4049_s21, 2  ;;  %s2616_s24 = sand.u32 1, %s4050_s19  }
 0xb4a   : > { %p4052_p1 = scmp.ne.s32.totalorder %s4051_s26, 0  ;;  %s2617_s25 = scalar_lea.sflag [#allocation4], %s2616_s24 }
 0xb4c   : > { %p2997_p6 = pnand %p3006_p13, %p4052_p1 }
 0xb4e   : > { %3303 = dma.done.wait (!%p2997_p6), %s2617_s25, 128  }
 0xb4f   : > { %3305 = vsyncadd (!%p2997_p6), %s2617_s25, 4294967168  ;;  %s4053_s24 = sld [smem:[#allocation15_spill]]  ;;  %s4054_s13 = sld [smem:[#allocation13_spill]] }
 0xb50   : > { %s4055_s23 = sld [smem:[#allocation16_spill]]  ;;  %s4056_s21 = smov %s3312_s22 }
 0xb55   : > { %p24_p9 = scmp.ge.s32.totalorder %s4053_s24, 4   ;;  %s4057_s22 = smov %s4054_s13 }
 0xb57   :  { %26 = sbr.rel (!%p24_p9) target bundleno = 7 (0x7), region = 126 }
 0xb5e   :  { %2622 = vsyncpa [#allocation3], 1 }
 0xb5f   :  { %2624 = vsyncpa [#allocation3 + $0x1], 1 }
 0xb60   :  { %2625 = vsyncpa [#allocation6], 1 }
 0xb61   :  { %2626 = vsyncpa [#allocation4], 1 }
 0xb62   :  { %2628 = vsyncpa [#allocation4 + $0x1], 1 }

</bundles_post_ra>
